<compile_context>
chip_gen: v7x
topology: tpu7x:2x2x1
jax: 0.10.0
libtpu: 0.0.40
codegen_flags: <defaults>
</compile_context>

<pallas_src>
import functools

import jax
import jax.numpy as jnp
from jax.experimental import pallas as pl
from jax.experimental.pallas import tpu as pltpu


def _round_up(x, m):
    return (x + m - 1) // m * m


# ----------------------------------------------------------------------------
# Pallas kernel: fused 4-layer MLP classifier head (one batch tile per step)
# ----------------------------------------------------------------------------
def _classifier_kernel(x_ref,
                       w1_ref, b1_ref,
                       w2_ref, b2_ref,
                       w3_ref, b3_ref,
                       w4_ref, b4_ref,
                       o_ref):
    x = x_ref[...]                                              # (tile_b, d_pad) bf16

    h = jnp.dot(x, w1_ref[...], preferred_element_type=jnp.float32) + b1_ref[...]
    h = jnp.maximum(h, 0.0).astype(jnp.bfloat16)                # ReLU -> bf16

    h = jnp.dot(h, w2_ref[...], preferred_element_type=jnp.float32) + b2_ref[...]
    h = jnp.maximum(h, 0.0).astype(jnp.bfloat16)

    h = jnp.dot(h, w3_ref[...], preferred_element_type=jnp.float32) + b3_ref[...]
    h = jnp.maximum(h, 0.0).astype(jnp.bfloat16)                # cast right away (v5e)

    # Final layer as padded 256 -> 128 MXU matmul: lane-dense, unmasked stores.
    o_ref[...] = (jnp.dot(h, w4_ref[...], preferred_element_type=jnp.float32)
                  + b4_ref[...])                                # (tile_b, nc_pad) f32


def _resident_spec(shape):
    """Constant-index BlockSpec (weights stay VMEM-resident across all tiles).

    Single-buffer the block when the installed Pallas exposes pipeline_mode /
    pl.Buffered (constant blocks don't need double-buffering -> v7x VMEM headroom).
    """
    idx_map = lambda i: (0, 0)
    if hasattr(pl, "Buffered"):
        try:
            return pl.BlockSpec(shape, idx_map, pipeline_mode=pl.Buffered(1))
        except TypeError:
            pass
    return pl.BlockSpec(shape, idx_map)


# ----------------------------------------------------------------------------
# One-time parameter preparation (hoisted out of the per-call path)
# ----------------------------------------------------------------------------
def prepare_classifier_params(params):
    """Pad / cast classifier weights once; returns (device_weights, meta)."""
    d_model = params["w1"].shape[0]
    num_classes = params["w4"].shape[1]
    d_pad = _round_up(max(d_model, 128), 128)            # K of first matmul
    nc_pad = _round_up(max(num_classes, 128), 128)       # lane-dense output width

    w1 = jnp.zeros((d_pad, 1024), jnp.bfloat16).at[:d_model].set(
        params["w1"].astype(jnp.bfloat16))
    w2 = params["w2"].astype(jnp.bfloat16)
    w3 = params["w3"].astype(jnp.bfloat16)
    w4 = jnp.zeros((256, nc_pad), jnp.bfloat16).at[:, :num_classes].set(
        params["w4"].astype(jnp.bfloat16))

    b1 = params["b1"].reshape(1, -1).astype(jnp.float32)
    b2 = params["b2"].reshape(1, -1).astype(jnp.float32)
    b3 = params["b3"].reshape(1, -1).astype(jnp.float32)
    b4 = jnp.zeros((1, nc_pad), jnp.float32).at[:, :num_classes].set(
        params["b4"].reshape(1, -1).astype(jnp.float32))

    weights = dict(w1=w1, b1=b1, w2=w2, b2=b2, w3=w3, b3=b3, w4=w4, b4=b4)
    meta = dict(d_model=d_model, num_classes=num_classes, d_pad=d_pad, nc_pad=nc_pad)
    return weights, meta


# ----------------------------------------------------------------------------
# Forward wrapper: pad activations, launch the batch-tiled grid
# ----------------------------------------------------------------------------
@functools.partial(jax.jit, static_argnames=("tile_b", "num_classes"))
def _classifier_forward_impl(feats, weights, *, tile_b, num_classes):
    B, d_model = feats.shape
    d_pad = weights["w1"].shape[0]
    nc_pad = weights["w4"].shape[1]

    b_pad = _round_up(max(B, tile_b), tile_b)
    nb = b_pad // tile_b

    # Pad + cast activations (zero rows/cols contribute 0 to the matmuls;
    # padded batch rows are sliced away below, never reduced over).
    x = jnp.zeros((b_pad, d_pad), jnp.bfloat16).at[:B, :d_model].set(
        feats.astype(jnp.bfloat16))

    weight_args = (weights["w1"], weights["b1"],
                   weights["w2"], weights["b2"],
                   weights["w3"], weights["b3"],
                   weights["w4"], weights["b4"])

    out = pl.pallas_call(
        _classifier_kernel,
        out_shape=jax.ShapeDtypeStruct((b_pad, nc_pad), jnp.float32),
        grid=(nb,),
        in_specs=[pl.BlockSpec((tile_b, d_pad), lambda i: (i, 0))]
                 + [_resident_spec(a.shape) for a in weight_args],
        out_specs=pl.BlockSpec((tile_b, nc_pad), lambda i: (i, 0)),
        compiler_params=pltpu.CompilerParams(
            dimension_semantics=("parallel",),       # batch tiles shard on v7x dual-TC
            vmem_limit_bytes=32 << 20),              # weight set + tiles << 32 MiB
    )(x, *weight_args)

    return out[:B, :num_classes]


def classifier_forward(feats, weights, num_classes, *, tile_b=None):
    """feats: (B, d_model) f32 encoder output. weights: prepare_classifier_params()[0]."""
    B = feats.shape[0]
    if tile_b is None:
        if B <= 256:
            # Small batch: pad only to a 16-row bf16 sublane pack, single tile.
            tile_b = max(16, _round_up(B, 16))
        else:
            # Large batch: big tiles to amortize ~0.35us/step overhead, but keep
            # >= 2 tiles so v7x dual-TC "parallel" sharding has work.
            tile_b = min(512, _round_up((B + 1) // 2, 16))
    return _classifier_forward_impl(feats, weights, tile_b=tile_b,
                                    num_classes=num_classes)


# ----------------------------------------------------------------------------
# Deterministic parameter init (PyTorch nn.Linear style: U(-1/sqrt(fan_in), .))
# ----------------------------------------------------------------------------
def init_params(key, d_model, num_classes=1):
    dims = [(d_model, 1024), (1024, 512), (512, 256), (256, num_classes)]
    params = {}
    for i, (fin, fout) in enumerate(dims, start=1):
        key, kw, kb = jax.random.split(key, 3)
        bound = 1.0 / jnp.sqrt(float(fin))
        params[f"w{i}"] = jax.random.uniform(kw, (fin, fout), jnp.float32,
                                             minval=-bound, maxval=bound)
        params[f"b{i}"] = jax.random.uniform(kb, (1, fout), jnp.float32,
                                             minval=-bound, maxval=bound)
    return params


# ----------------------------------------------------------------------------
# Encoder stand-in (plain JAX glue): mel (B, n_mels, T) -> features (B, d_model)
# ----------------------------------------------------------------------------
def encoder_standin(mel, enc_proj, ln_gamma, ln_beta):
    feats = jnp.einsum("bct,cd->btd", mel, enc_proj)        # (B, T, d_model)
    feats = feats.mean(axis=1)                              # (B, d_model)
    mu = feats.mean(axis=-1, keepdims=True)
    var = feats.var(axis=-1, keepdims=True)
    feats = (feats - mu) * jax.lax.rsqrt(var + 1e-5)
    return feats * ln_gamma + ln_beta


# ----------------------------------------------------------------------------
# Reference (plain JAX, same bf16-matmul / f32-accumulate precision as kernel)
# ----------------------------------------------------------------------------
def classifier_ref(feats, p):
    def lin(h, w, b):
        return jnp.dot(h.astype(jnp.bfloat16), w.astype(jnp.bfloat16),
                       preferred_element_type=jnp.float32) + b.reshape(1, -1)
    h = jnp.maximum(lin(feats, p["w1"], p["b1"]), 0.0)
    h = jnp.maximum(lin(h, p["w2"], p["b2"]), 0.0)
    h = jnp.maximum(lin(h, p["w3"], p["b3"]), 0.0)
    return lin(h, p["w4"], p["b4"])


if __name__ == "__main__":
    B, N_MELS, T = 2, 8, 16          # small synthetic mel spectrogram
    D_MODEL = 128                    # encoder.ln_post.normalized_shape[0]
    NUM_CLASSES = 1

    key = jax.random.PRNGKey(0)
    k_mel, k_proj, k_params = jax.random.split(key, 3)

    mel = jax.random.normal(k_mel, (B, N_MELS, T), jnp.float32)
    enc_proj = jax.random.normal(k_proj, (N_MELS, D_MODEL), jnp.float32) * 0.1
    ln_gamma = jnp.ones((D_MODEL,), jnp.float32)
    ln_beta = jnp.zeros((D_MODEL,), jnp.float32)
    params = init_params(k_params, D_MODEL, NUM_CLASSES)

    # One-time weight prep (pad + cast), hoisted out of the per-call path.
    dev_weights, meta = prepare_classifier_params(params)

    feats = encoder_standin(mel, enc_proj, ln_gamma, ln_beta)          # (B, d_model)

    logits = classifier_forward(feats, dev_weights, meta["num_classes"])
    logits = jax.block_until_ready(logits)

    ref = classifier_ref(feats, params)
    assert logits.shape == (B, NUM_CLASSES)
    assert jnp.allclose(logits, ref, atol=1e-2, rtol=1e-2), "mismatch vs reference"

    print("KERNEL_OK")
</pallas_src>

<mosaic_0001>
module attributes {stable_mosaic.version = 11 : i64} {
  func.func @_classifier_kernel(%arg0: i32, %arg1: memref<16x128xbf16, #tpu.memory_space<vmem>>, %arg2: memref<128x1024xbf16, #tpu.memory_space<vmem>>, %arg3: memref<1x1024xf32, #tpu.memory_space<vmem>>, %arg4: memref<1024x512xbf16, #tpu.memory_space<vmem>>, %arg5: memref<1x512xf32, #tpu.memory_space<vmem>>, %arg6: memref<512x256xbf16, #tpu.memory_space<vmem>>, %arg7: memref<1x256xf32, #tpu.memory_space<vmem>>, %arg8: memref<256x128xbf16, #tpu.memory_space<vmem>>, %arg9: memref<1x128xf32, #tpu.memory_space<vmem>>, %arg10: memref<16x128xf32, #tpu.memory_space<vmem>>) attributes {dimension_semantics = [#tpu.dimension_semantics<parallel>], iteration_bounds = array<i64: 1>, scalar_prefetch = 0 : i64, scratch_operands = 0 : i64, tpu.core_type = #tpu.core_type<tc>, window_params = [{transform_indices = @transform_0, window_bounds = array<i64: 16, 128>}, {pipeline_mode = #tpu.pipeline_mode<synchronous>, transform_indices = @transform_1, window_bounds = array<i64: 128, 1024>}, {pipeline_mode = #tpu.pipeline_mode<synchronous>, transform_indices = @transform_2, window_bounds = array<i64: 1, 1024>}, {pipeline_mode = #tpu.pipeline_mode<synchronous>, transform_indices = @transform_3, window_bounds = array<i64: 1024, 512>}, {pipeline_mode = #tpu.pipeline_mode<synchronous>, transform_indices = @transform_4, window_bounds = array<i64: 1, 512>}, {pipeline_mode = #tpu.pipeline_mode<synchronous>, transform_indices = @transform_5, window_bounds = array<i64: 512, 256>}, {pipeline_mode = #tpu.pipeline_mode<synchronous>, transform_indices = @transform_6, window_bounds = array<i64: 1, 256>}, {pipeline_mode = #tpu.pipeline_mode<synchronous>, transform_indices = @transform_7, window_bounds = array<i64: 256, 128>}, {pipeline_mode = #tpu.pipeline_mode<synchronous>, transform_indices = @transform_8, window_bounds = array<i64: 1, 128>}, {transform_indices = @transform_9, window_bounds = array<i64: 16, 128>}]} {
    %c0 = arith.constant 0 : index
    %c0_0 = arith.constant 0 : index
    %0 = vector.load %arg1[%c0, %c0_0] : memref<16x128xbf16, #tpu.memory_space<vmem>>, vector<16x128xbf16>
    %c0_1 = arith.constant 0 : index
    %c0_2 = arith.constant 0 : index
    %1 = vector.load %arg2[%c0_1, %c0_2] : memref<128x1024xbf16, #tpu.memory_space<vmem>>, vector<128x1024xbf16>
    %cst = arith.constant dense<0.000000e+00> : vector<16x1024xf32>
    %2 = tpu.matmul %0, %1, %cst {dimension_numbers = #tpu.dot_dimension_numbers<[1], [0], [0], [1], [0, 0, 1, 1], [], []>} : vector<16x128xbf16>, vector<128x1024xbf16>, vector<16x1024xf32> -> vector<16x1024xf32>
    %c0_3 = arith.constant 0 : index
    %c0_4 = arith.constant 0 : index
    %3 = vector.load %arg3[%c0_3, %c0_4] : memref<1x1024xf32, #tpu.memory_space<vmem>>, vector<1x1024xf32>
    %4 = vector.broadcast %3 : vector<1x1024xf32> to vector<16x1024xf32>
    %5 = arith.addf %2, %4 : vector<16x1024xf32>
    %cst_5 = arith.constant 0.000000e+00 : f32
    %6 = vector.broadcast %cst_5 : f32 to vector<16x1024xf32>
    %7 = arith.maximumf %5, %6 : vector<16x1024xf32>
    %8 = arith.truncf %7 : vector<16x1024xf32> to vector<16x1024xbf16>
    %c0_6 = arith.constant 0 : index
    %c0_7 = arith.constant 0 : index
    %9 = vector.load %arg4[%c0_6, %c0_7] : memref<1024x512xbf16, #tpu.memory_space<vmem>>, vector<1024x512xbf16>
    %cst_8 = arith.constant dense<0.000000e+00> : vector<16x512xf32>
    %10 = tpu.matmul %8, %9, %cst_8 {dimension_numbers = #tpu.dot_dimension_numbers<[1], [0], [0], [1], [0, 0, 1, 1], [], []>} : vector<16x1024xbf16>, vector<1024x512xbf16>, vector<16x512xf32> -> vector<16x512xf32>
    %c0_9 = arith.constant 0 : index
    %c0_10 = arith.constant 0 : index
    %11 = vector.load %arg5[%c0_9, %c0_10] : memref<1x512xf32, #tpu.memory_space<vmem>>, vector<1x512xf32>
    %12 = vector.broadcast %11 : vector<1x512xf32> to vector<16x512xf32>
    %13 = arith.addf %10, %12 : vector<16x512xf32>
    %cst_11 = arith.constant 0.000000e+00 : f32
    %14 = vector.broadcast %cst_11 : f32 to vector<16x512xf32>
    %15 = arith.maximumf %13, %14 : vector<16x512xf32>
    %16 = arith.truncf %15 : vector<16x512xf32> to vector<16x512xbf16>
    %c0_12 = arith.constant 0 : index
    %c0_13 = arith.constant 0 : index
    %17 = vector.load %arg6[%c0_12, %c0_13] : memref<512x256xbf16, #tpu.memory_space<vmem>>, vector<512x256xbf16>
    %cst_14 = arith.constant dense<0.000000e+00> : vector<16x256xf32>
    %18 = tpu.matmul %16, %17, %cst_14 {dimension_numbers = #tpu.dot_dimension_numbers<[1], [0], [0], [1], [0, 0, 1, 1], [], []>} : vector<16x512xbf16>, vector<512x256xbf16>, vector<16x256xf32> -> vector<16x256xf32>
    %c0_15 = arith.constant 0 : index
    %c0_16 = arith.constant 0 : index
    %19 = vector.load %arg7[%c0_15, %c0_16] : memref<1x256xf32, #tpu.memory_space<vmem>>, vector<1x256xf32>
    %20 = vector.broadcast %19 : vector<1x256xf32> to vector<16x256xf32>
    %21 = arith.addf %18, %20 : vector<16x256xf32>
    %cst_17 = arith.constant 0.000000e+00 : f32
    %22 = vector.broadcast %cst_17 : f32 to vector<16x256xf32>
    %23 = arith.maximumf %21, %22 : vector<16x256xf32>
    %24 = arith.truncf %23 : vector<16x256xf32> to vector<16x256xbf16>
    %c0_18 = arith.constant 0 : index
    %c0_19 = arith.constant 0 : index
    %25 = vector.load %arg8[%c0_18, %c0_19] : memref<256x128xbf16, #tpu.memory_space<vmem>>, vector<256x128xbf16>
    %cst_20 = arith.constant dense<0.000000e+00> : vector<16x128xf32>
    %26 = tpu.matmul %24, %25, %cst_20 {dimension_numbers = #tpu.dot_dimension_numbers<[1], [0], [0], [1], [0, 0, 1, 1], [], []>} : vector<16x256xbf16>, vector<256x128xbf16>, vector<16x128xf32> -> vector<16x128xf32>
    %c0_21 = arith.constant 0 : index
    %c0_22 = arith.constant 0 : index
    %27 = vector.load %arg9[%c0_21, %c0_22] : memref<1x128xf32, #tpu.memory_space<vmem>>, vector<1x128xf32>
    %28 = vector.broadcast %27 : vector<1x128xf32> to vector<16x128xf32>
    %29 = arith.addf %26, %28 : vector<16x128xf32>
    %c0_23 = arith.constant 0 : index
    %c0_24 = arith.constant 0 : index
    %30 = vector.load %arg10[%c0_23, %c0_24] : memref<16x128xf32, #tpu.memory_space<vmem>>, vector<16x128xf32>
    tpu.vector_store %arg10[%c0_23, %c0_24], %29 {strides = array<i32>} : memref<16x128xf32, #tpu.memory_space<vmem>>, vector<16x128xf32>,
    return
  }
  func.func @transform_0(%arg0: i32) -> (i32, i32) {
    %c0_i32 = arith.constant 0 : i32
    %c0_i32_0 = arith.constant 0 : i32
    return %arg0, %c0_i32 : i32, i32
  }
  func.func @transform_1(%arg0: i32) -> (i32, i32) {
    %c0_i32 = arith.constant 0 : i32
    %c0_i32_0 = arith.constant 0 : i32
    %c0_i32_1 = arith.constant 0 : i32
    return %c0_i32, %c0_i32_0 : i32, i32
  }
  func.func @transform_2(%arg0: i32) -> (i32, i32) {
    %c0_i32 = arith.constant 0 : i32
    %c0_i32_0 = arith.constant 0 : i32
    %c0_i32_1 = arith.constant 0 : i32
    return %c0_i32, %c0_i32_0 : i32, i32
  }
  func.func @transform_3(%arg0: i32) -> (i32, i32) {
    %c0_i32 = arith.constant 0 : i32
    %c0_i32_0 = arith.constant 0 : i32
    %c0_i32_1 = arith.constant 0 : i32
    return %c0_i32, %c0_i32_0 : i32, i32
  }
  func.func @transform_4(%arg0: i32) -> (i32, i32) {
    %c0_i32 = arith.constant 0 : i32
    %c0_i32_0 = arith.constant 0 : i32
    %c0_i32_1 = arith.constant 0 : i32
    return %c0_i32, %c0_i32_0 : i32, i32
  }
  func.func @transform_5(%arg0: i32) -> (i32, i32) {
    %c0_i32 = arith.constant 0 : i32
    %c0_i32_0 = arith.constant 0 : i32
    %c0_i32_1 = arith.constant 0 : i32
    return %c0_i32, %c0_i32_0 : i32, i32
  }
  func.func @transform_6(%arg0: i32) -> (i32, i32) {
    %c0_i32 = arith.constant 0 : i32
    %c0_i32_0 = arith.constant 0 : i32
    %c0_i32_1 = arith.constant 0 : i32
    return %c0_i32, %c0_i32_0 : i32, i32
  }
  func.func @transform_7(%arg0: i32) -> (i32, i32) {
    %c0_i32 = arith.constant 0 : i32
    %c0_i32_0 = arith.constant 0 : i32
    %c0_i32_1 = arith.constant 0 : i32
    return %c0_i32, %c0_i32_0 : i32, i32
  }
  func.func @transform_8(%arg0: i32) -> (i32, i32) {
    %c0_i32 = arith.constant 0 : i32
    %c0_i32_0 = arith.constant 0 : i32
    %c0_i32_1 = arith.constant 0 : i32
    return %c0_i32, %c0_i32_0 : i32, i32
  }
  func.func @transform_9(%arg0: i32) -> (i32, i32) {
    %c0_i32 = arith.constant 0 : i32
    %c0_i32_0 = arith.constant 0 : i32
    return %arg0, %c0_i32 : i32, i32
  }
}

</mosaic_0001>

<bundles_post_ra>
// kernel: _classifier_forward_impl.1
= control target key start
LH: loop header
LB: loop body
LE: loop exit
PB: predicated region body
PF: predicated region fallthrough
CT: control target
= control target key end

     0   :  { %14 = vsyncpa [#allocation3], 0  ;;  %s4576_s0 = inlined_call_operand.vmem [shape: bf16[16,128], index: 0, kind: input, shape index: {}]   ;;  %s4577_s1 = inlined_call_operand.hbm [shape: bf16[128,1024], index: 1, kind: input, shape index: {}]   ;;  %s4578_s2 = inlined_call_operand.vmem [shape: f32[1,1024], index: 2, kind: input, shape index: {}]   ;;  %s4579_s3 = inlined_call_operand.hbm [shape: bf16[1024,512], index: 3, kind: input, shape index: {}]   ;;  %s4580_s4 = inlined_call_operand.vmem [shape: f32[1,512], index: 4, kind: input, shape index: {}]   ;;  %s4581_s5 = inlined_call_operand.hbm [shape: bf16[512,256], index: 5, kind: input, shape index: {}]   ;;  %s4582_s6 = inlined_call_operand.vmem [shape: f32[1,256], index: 6, kind: input, shape index: {}]   ;;  %s4583_s7 = inlined_call_operand.hbm [shape: bf16[256,128], index: 7, kind: input, shape index: {}]   ;;  %s4584_s8 = inlined_call_operand.vmem [shape: f32[1,128], index: 8, kind: input, shape index: {}]   ;;  %s4585_s9 = inlined_call_operand.vmem [shape: f32[16,128], index: 9, kind: output, shape index: {}]  }
   0x1   :  { %15 = vsyncpa [#allocation5], 0 }
   0x2   :  { %16 = vsyncpa [#allocation8], 0  ;;  %s4373_s30 = smov [#allocation4]   ;;  %s4279_s13 = scalar_lea.hbm %s4579_s3, 32768 }
   0x3   :  { %s38_s10 = sshll.u32 %s4373_s30, 4  ;;  %p4280_p0 = scmp.ne.s32.totalorder %s4579_s3, %s4279_s13  ;;  %s39_s10 = int_to_ptr.vmem [resolvable:$true] %s38_s10 }
   0x4   :  { %p4283_p1 = scmp.lt.u32.totalorder %s4279_s13, %s4579_s3 }
   0x6   :  { %p4285_p2 = pnand %p4283_p1, %p4280_p0 }
   0x8   :  { %4288 = shalt.err (!%p4285_p2)
}
   0x9   :  { %s4289_s18 = scalar_lea.vmem %s39_s10, 32768  ;;  %p4294_p4 = scmp.lt.s32.totalorder %s39_s10, %s39_s10 }
   0xa   :  { %p4290_p3 = scmp.ne.s32.totalorder %s39_s10, %s4289_s18  ;;  %p4295_p5 = scmp.lt.s32.totalorder %s4289_s18, %s4289_s18 }
   0xc   :  { %p4296_p6 = por %p4295_p5, %p4294_p4 }
   0xe   :  { %p4297_p7 = pnand %p4296_p6, %p4290_p3 }
  0x10   :  { %4300 = shalt.err (!%p4297_p7)
}
  0x11   :  { %s4374_s19 = smov 256   ;;  %s4375_s20 = smov 16  }
  0x12   :  { %44 = dma.hbm_to_vmem [thread:$0]  %s4579_s3, 32768, %s39_s10, [#allocation5], %s4374_s19, %s4374_s19, %s4375_s20  }
  0x13   :  { %s4376_s23 = smov [#allocation2]   ;;  %s4301_s27 = scalar_lea.hbm %s4577_s1, 8192 }
  0x14   :  { %s24_s24 = sshll.u32 %s4376_s23, 4  ;;  %p4302_p8 = scmp.ne.s32.totalorder %s4577_s1, %s4301_s27  ;;  %s25_s24 = int_to_ptr.vmem [resolvable:$true] %s24_s24 }
  0x15   :  { %p4305_p9 = scmp.lt.u32.totalorder %s4301_s27, %s4577_s1 }
  0x17   :  { %p4307_p10 = pnand %p4305_p9, %p4302_p8 }
  0x19   :  { %4310 = shalt.err (!%p4307_p10)
}
  0x1a   :  { %s4311_s12 = scalar_lea.vmem %s25_s24, 8192  ;;  %p4316_p12 = scmp.lt.s32.totalorder %s25_s24, %s25_s24 }
  0x1b   :  { %p4312_p11 = scmp.ne.s32.totalorder %s25_s24, %s4311_s12  ;;  %p4317_p13 = scmp.lt.s32.totalorder %s4311_s12, %s4311_s12 }
  0x1d   :  { %p4318_p0 = por %p4317_p13, %p4316_p12 }
  0x1f   :  { %p4319_p1 = pnand %p4318_p0, %p4312_p11 }
  0x21   :  { %4322 = shalt.err (!%p4319_p1)
}
  0x22   :  { %s4377_s3 = smov 512   ;;  %s4378_s10 = smov 32  }
  0x23   :  { %30 = dma.hbm_to_vmem [thread:$0]  %s4577_s1, 8192, %s25_s24, [#allocation3], %s4377_s3, %s4377_s3, %s4378_s10  }
  0x24   :  { %s4379_s15 = smov [#allocation6]   ;;  %s4323_s19 = scalar_lea.hbm %s4581_s5, 8192 }
  0x25   :  { %s52_s16 = sshll.u32 %s4379_s15, 4  ;;  %p4324_p2 = scmp.ne.s32.totalorder %s4581_s5, %s4323_s19  ;;  %s53_s16 = int_to_ptr.vmem [resolvable:$true] %s52_s16 }
  0x26   :  { %p4327_p3 = scmp.lt.u32.totalorder %s4323_s19, %s4581_s5 }
  0x28   :  { %p4329_p4 = pnand %p4327_p3, %p4324_p2 }
  0x2a   :  { %4332 = shalt.err (!%p4329_p4)
}
  0x2b   :  { %s4333_s25 = scalar_lea.vmem %s53_s16, 8192  ;;  %p4338_p6 = scmp.lt.s32.totalorder %s53_s16, %s53_s16 }
  0x2c   :  { %p4334_p5 = scmp.ne.s32.totalorder %s53_s16, %s4333_s25  ;;  %p4339_p7 = scmp.lt.s32.totalorder %s4333_s25, %s4333_s25 }
  0x2e   :  { %p4340_p8 = por %p4339_p7, %p4338_p6 }
  0x30   :  { %p4341_p9 = pnand %p4340_p8, %p4334_p5 }
  0x32   :  { %4344 = shalt.err (!%p4341_p9)
}
  0x33   :  { %s4380_s1 = smov 128   ;;  %s4381_s24 = smov 8  }
  0x34   :  { %58 = dma.hbm_to_vmem [thread:$0]  %s4581_s5, 8192, %s53_s16, [#allocation5], %s4380_s1, %s4380_s1, %s4381_s24  }
  0x35   :  { %s4382_s28 = smov [#allocation7]   ;;  %s4345_s12 = scalar_lea.hbm %s4583_s7, 2048 }
  0x36   :  { %s66_s29 = sshll.u32 %s4382_s28, 4  ;;  %p4346_p10 = scmp.ne.s32.totalorder %s4583_s7, %s4345_s12  ;;  %s67_s29 = int_to_ptr.vmem [resolvable:$true] %s66_s29 }
  0x37   :  { %p4349_p11 = scmp.lt.u32.totalorder %s4345_s12, %s4583_s7 }
  0x39   :  { %p4351_p12 = pnand %p4349_p11, %p4346_p10 }
  0x3b   :  { %4354 = shalt.err (!%p4351_p12)
}
  0x3c   :  { %s4355_s15 = scalar_lea.vmem %s67_s29, 2048  ;;  %p4360_p0 = scmp.lt.s32.totalorder %s67_s29, %s67_s29 }
  0x3d   :  { %p4356_p13 = scmp.ne.s32.totalorder %s67_s29, %s4355_s15  ;;  %p4361_p1 = scmp.lt.s32.totalorder %s4355_s15, %s4355_s15 }
  0x3f   :  { %p4362_p2 = por %p4361_p1, %p4360_p0 }
  0x41   :  { %p4363_p3 = pnand %p4362_p2, %p4356_p13 }
  0x43   :  { %4366 = shalt.err (!%p4363_p3)
}
  0x44   :  { %s4383_s5 = smov 64   ;;  %s4384_s16 = smov 4  }
  0x45   :  { %72 = dma.hbm_to_vmem [thread:$0]  %s4583_s7, 2048, %s67_s29, [#allocation8], %s4383_s5, %s4383_s5, %s4384_s16  }
  0x46   :  { %4367 = dma.done.wait [#allocation3], 8192  }
  0x47   :  { %4368 = vsyncadd [#allocation3], 4294959104 }
  0x48   :  { %4369 = dma.done.wait [#allocation5], 40960  }
  0x49   :  { %4370 = vsyncadd [#allocation5], 4294926336 }
  0x4a   :  { %4371 = dma.done.wait [#allocation8], 2048  }
  0x4b   :  { %4372 = vsyncadd [#allocation8], 4294965248  ;;  %v4385_v0 = vmov 0   ;;  %v90_v1 = vld [vmem:[#allocation2] sm:$0xff]  ;;  %v92_v18 = vld [vmem:[#allocation2 + $0x10] sm:$0xff] }
  0x4c   :  { %554 = vmatprep.mubr.bf16.mxu1 %v4385_v0  ;;  %640 = vmatprep.mubr.bf16.mxu0 %v4385_v0  ;;  %v94_v2 = vld [vmem:[#allocation2 + $0x20] sm:$0xff]  ;;  %v96_v20 = vld [vmem:[#allocation2 + $0x30] sm:$0xff]  ;;  %v91_v48 = vld [vmem:[#allocation2 + $0x8] sm:$0xff] }
  0x4d   :  { %v98_v3 = vld [vmem:[#allocation2 + $0x40] sm:$0xff]  ;;  %v3307_v4 = vcombine.high %v90_v1, %v94_v2  ;;  %v3306_v5 = vcombine.low %v90_v1, %v94_v2  ;;  %v100_v21 = vld [vmem:[#allocation2 + $0x50] sm:$0xff]  ;;  %v3311_v25 = vcombine.high %v92_v18, %v96_v20  ;;  %v3310_v26 = vcombine.low %v92_v18, %v96_v20  ;;  %v95_v49 = vld [vmem:[#allocation2 + $0x28] sm:$0xff] }
  0x4e   :  { %v102_v6 = vld [vmem:[#allocation2 + $0x60] sm:$0xff]  ;;  %v104_v22 = vld [vmem:[#allocation2 + $0x70] sm:$0xff]  ;;  %v3309_v58 = vcombine.high %v91_v48, %v95_v49  ;;  %v99_v59 = vld [vmem:[#allocation2 + $0x48] sm:$0xff]  ;;  %v3308_v1 = vcombine.low %v91_v48, %v95_v49 }
  0x4f   :  { %v3315_v7 = vcombine.high %v98_v3, %v102_v6  ;;  %v106_v8 = vld [vmem:[#allocation2 + $0x80] sm:$0xff]  ;;  %522 = vmatprep.subr.bf16.mxu1 %v3307_v4  ;;  %v3314_v10 = vcombine.low %v98_v3, %v102_v6  ;;  %v3319_v27 = vcombine.high %v100_v21, %v104_v22  ;;  %v108_v29 = vld [vmem:[#allocation2 + $0x90] sm:$0xff]  ;;  %608 = vmatprep.subr.bf16.mxu0 %v3311_v25  ;;  %v103_v61 = vld [vmem:[#allocation2 + $0x68] sm:$0xff] }
  0x50   :  { %v110_v9 = vld [vmem:[#allocation2 + $0xa0] sm:$0xff]  ;;  %523 = vmatpush1.bf16.msra.mxu1 %v3306_v5  ;;  %v112_v30 = vld [vmem:[#allocation2 + $0xb0] sm:$0xff]  ;;  %609 = vmatpush1.bf16.msra.mxu0 %v3310_v26  ;;  %v3318_v32 = vcombine.low %v100_v21, %v104_v22  ;;  %v3317_v2 = vcombine.high %v99_v59, %v103_v61  ;;  %v107_v3 = vld [vmem:[#allocation2 + $0x88] sm:$0xff] }
  0x51   :  { %524 = vmatprep.subr.bf16.mxu1 %v3315_v7  ;;  %v3323_v11 = vcombine.high %v106_v8, %v110_v9  ;;  %v114_v12 = vld [vmem:[#allocation2 + $0xc0] sm:$0xff]  ;;  %v3322_v14 = vcombine.low %v106_v8, %v110_v9  ;;  %610 = vmatprep.subr.bf16.mxu0 %v3319_v27  ;;  %v3327_v35 = vcombine.high %v108_v29, %v112_v30  ;;  %v116_v37 = vld [vmem:[#allocation2 + $0xd0] sm:$0xff]  ;;  %v111_v5 = vld [vmem:[#allocation2 + $0xa8] sm:$0xff] }
  0x52   :  { %v118_v13 = vld [vmem:[#allocation2 + $0xe0] sm:$0xff]  ;;  %v120_v38 = vld [vmem:[#allocation2 + $0xf0] sm:$0xff]  ;;  %v3326_v40 = vcombine.low %v108_v29, %v112_v30  ;;  %v3316_v9 = vcombine.low %v99_v59, %v103_v61  ;;  %v127_v18 = vld [vmem:[#allocation2 + $0x128] sm:$0xff] }
  0x53   :  { %v3331_v15 = vcombine.high %v114_v12, %v118_v13  ;;  %v122_v16 = vld [vmem:[#allocation2 + $0x100] sm:$0xff]  ;;  %v3330_v19 = vcombine.low %v114_v12, %v118_v13  ;;  %v3335_v44 = vcombine.high %v116_v37, %v120_v38  ;;  %v124_v45 = vld [vmem:[#allocation2 + $0x110] sm:$0xff]  ;;  %v3334_v50 = vcombine.low %v116_v37, %v120_v38  ;;  %v119_v13 = vld [vmem:[#allocation2 + $0xe8] sm:$0xff] }
  0x54   :  { %525 = vmatpush1.bf16.msra.mxu1 %v3314_v10  ;;  %v126_v17 = vld [vmem:[#allocation2 + $0x120] sm:$0xff]  ;;  %611 = vmatpush1.bf16.msra.mxu0 %v3318_v32  ;;  %v128_v46 = vld [vmem:[#allocation2 + $0x130] sm:$0xff]  ;;  %v3325_v10 = vcombine.high %v107_v3, %v111_v5  ;;  %v131_v22 = vld [vmem:[#allocation2 + $0x148] sm:$0xff] }
  0x55   :  { %526 = vmatprep.subr.bf16.mxu1 %v3323_v11  ;;  %v3339_v23 = vcombine.high %v122_v16, %v126_v17  ;;  %v130_v24 = vld [vmem:[#allocation2 + $0x140] sm:$0xff]  ;;  %v3338_v31 = vcombine.low %v122_v16, %v126_v17  ;;  %612 = vmatprep.subr.bf16.mxu0 %v3327_v35  ;;  %v3343_v52 = vcombine.high %v124_v45, %v128_v46  ;;  %v132_v53 = vld [vmem:[#allocation2 + $0x150] sm:$0xff]  ;;  %v115_v11 = vld [vmem:[#allocation2 + $0xc8] sm:$0xff] }
  0x56   :  { %v134_v28 = vld [vmem:[#allocation2 + $0x160] sm:$0xff]  ;;  %v136_v54 = vld [vmem:[#allocation2 + $0x170] sm:$0xff]  ;;  %v3342_v56 = vcombine.low %v124_v45, %v128_v46  ;;  %v123_v16 = vld [vmem:[#allocation2 + $0x108] sm:$0xff]  ;;  %v3333_v17 = vcombine.high %v115_v11, %v119_v13  ;;  %v3332_v21 = vcombine.low %v115_v11, %v119_v13 }
  0x57   :  { %v3347_v33 = vcombine.high %v130_v24, %v134_v28  ;;  %v138_v34 = vld [vmem:[#allocation2 + $0x180] sm:$0xff]  ;;  %v3346_v39 = vcombine.low %v130_v24, %v134_v28  ;;  %v3351_v60 = vcombine.high %v132_v53, %v136_v54  ;;  %v140_v62 = vld [vmem:[#allocation2 + $0x190] sm:$0xff]  ;;  %v3350_v4 = vcombine.low %v132_v53, %v136_v54  ;;  %v139_v28 = vld [vmem:[#allocation2 + $0x188] sm:$0xff] }
  0x58   :  { %527 = vmatpush1.bf16.msra.mxu1 %v3322_v14  ;;  %v142_v36 = vld [vmem:[#allocation2 + $0x1a0] sm:$0xff]  ;;  %613 = vmatpush1.bf16.msra.mxu0 %v3326_v40  ;;  %v144_v63 = vld [vmem:[#allocation2 + $0x1b0] sm:$0xff]  ;;  %v3341_v24 = vcombine.high %v123_v16, %v127_v18  ;;  %v3340_v27 = vcombine.low %v123_v16, %v127_v18  ;;  %v143_v29 = vld [vmem:[#allocation2 + $0x1a8] sm:$0xff] }
  0x59   :  { %528 = vmatprep.subr.bf16.mxu1 %v3331_v15  ;;  %v3355_v41 = vcombine.high %v138_v34, %v142_v36  ;;  %v146_v42 = vld [vmem:[#allocation2 + $0x1c0] sm:$0xff]  ;;  %v3354_v47 = vcombine.low %v138_v34, %v142_v36  ;;  %614 = vmatprep.subr.bf16.mxu0 %v3335_v44  ;;  %v3359_v6 = vcombine.high %v140_v62, %v144_v63  ;;  %v148_v7 = vld [vmem:[#allocation2 + $0x1d0] sm:$0xff]  ;;  %v147_v34 = vld [vmem:[#allocation2 + $0x1c8] sm:$0xff] }
  0x5a   :  { %v150_v43 = vld [vmem:[#allocation2 + $0x1e0] sm:$0xff]  ;;  %v152_v8 = vld [vmem:[#allocation2 + $0x1f0] sm:$0xff]  ;;  %v3358_v12 = vcombine.low %v140_v62, %v144_v63  ;;  %v3324_v15 = vcombine.low %v107_v3, %v111_v5  ;;  %v151_v35 = vld [vmem:[#allocation2 + $0x1e8] sm:$0xff]  ;;  %v3357_v36 = vcombine.high %v139_v28, %v143_v29 }
  0x5b   :  { %v3363_v51 = vcombine.high %v146_v42, %v150_v43  ;;  %v3362_v55 = vcombine.low %v146_v42, %v150_v43  ;;  %v4489_v57 = vld [vmem:[%s4576_s0] sm:$0xff]   ;;  %v3367_v14 = vcombine.high %v148_v7, %v152_v8  ;;  %v93_v40 = vld [vmem:[#allocation2 + $0x18] sm:$0xff]  ;;  %v3365_v42 = vcombine.high %v147_v34, %v151_v35 }
  0x5c   :  { %529 = vmatpush1.bf16.msra.mxu1 %v3330_v19  ;;  %615 = vmatpush1.bf16.msra.mxu0 %v3334_v50  ;;  %v3366_v19 = vcombine.low %v148_v7, %v152_v8  ;;  %v3785_v20 = vld [vmem:[#allocation4 + $0x4] ss:$16 sps:$4 sm:$0xff]   ;;  %v3783_v25 = vld [vmem:[#allocation4] ss:$16 sps:$4 sm:$0xff]   ;;  %v3364_v46 = vcombine.low %v147_v34, %v151_v35  ;;  %v105_v48 = vld [vmem:[#allocation2 + $0x78] sm:$0xff] }
  0x5d   :  { %530 = vmatprep.subr.bf16.mxu1 %v3339_v23  ;;  %616 = vmatprep.subr.bf16.mxu0 %v3343_v52  ;;  %v135_v23 = vld [vmem:[#allocation2 + $0x168] sm:$0xff]  ;;  %v3791_v26 = vld [vmem:[#allocation4 + $0x24] ss:$16 sps:$4 sm:$0xff]   ;;  %v3795_v37 = vld [vmem:[#allocation4 + $0x40] ss:$16 sps:$4 sm:$0xff]  }
  0x5e   :  { %v3349_v30 = vcombine.high %v131_v22, %v135_v23  ;;  %v3797_v32 = vld [vmem:[#allocation4 + $0x44] ss:$16 sps:$4 sm:$0xff]   ;;  %v3801_v43 = vld [vmem:[#allocation4 + $0x60] ss:$16 sps:$4 sm:$0xff]   ;;  %v109_v53 = vld [vmem:[#allocation2 + $0x98] sm:$0xff] }
  0x5f   :  { %v3803_v38 = vld [vmem:[#allocation4 + $0x64] ss:$16 sps:$4 sm:$0xff]   ;;  %v3807_v45 = vld [vmem:[#allocation4 + $0x80] ss:$16 sps:$4 sm:$0xff]   ;;  %v113_v54 = vld [vmem:[#allocation2 + $0xb8] sm:$0xff] }
  0x60   :  { %531 = vmatpush1.bf16.msra.mxu1 %v3338_v31  ;;  %617 = vmatpush1.bf16.msra.mxu0 %v3342_v56  ;;  %v3789_v31 = vld [vmem:[#allocation4 + $0x20] ss:$16 sps:$4 sm:$0xff]   ;;  %v3809_v44 = vld [vmem:[#allocation4 + $0x84] ss:$16 sps:$4 sm:$0xff]   ;;  %v121_v61 = vld [vmem:[#allocation2 + $0xf8] sm:$0xff]  ;;  %v3329_v63 = vcombine.high %v109_v53, %v113_v54 }
  0x61   :  { %532 = vmatprep.subr.bf16.mxu1 %v3347_v33  ;;  %618 = vmatprep.subr.bf16.mxu0 %v3351_v60  ;;  %v3348_v33 = vcombine.low %v131_v22, %v135_v23  ;;  %v3815_v49 = vld [vmem:[#allocation4 + $0xa4] ss:$16 sps:$4 sm:$0xff]   ;;  %v117_v60 = vld [vmem:[#allocation2 + $0xd8] sm:$0xff]  ;;  %v3831_v7 = vld [vmem:[#allocation4 + $0x100] ss:$16 sps:$4 sm:$0xff]  }
  0x62   :  { %v3827_v62 = vld [vmem:[#allocation4 + $0xe4] ss:$16 sps:$4 sm:$0xff]   ;;  %v125_v3 = vld [vmem:[#allocation2 + $0x118] sm:$0xff]  ;;  %v3336_v8 = vcombine.low %v117_v60, %v121_v61  ;;  %v3843_v18 = vld [vmem:[#allocation4 + $0x140] ss:$16 sps:$4 sm:$0xff]  }
  0x63   :  { %v3833_v5 = vld [vmem:[#allocation4 + $0x104] ss:$16 sps:$4 sm:$0xff]   ;;  %v3861_v34 = vld [vmem:[#allocation4 + $0x1a0] ss:$16 sps:$4 sm:$0xff]   ;;  %v3792_v35 = vld [vmem:[#allocation4 + $0x28] ss:$16 sps:$4 sm:$0xff]  }
  0x64   :  { %533 = vmatpush1.bf16.msra.mxu1 %v3346_v39  ;;  %619 = vmatpush1.bf16.msra.mxu0 %v3350_v4  ;;  %v3356_v39 = vcombine.low %v139_v28, %v143_v29  ;;  %v129_v4 = vld [vmem:[#allocation2 + $0x138] sm:$0xff]  ;;  %v3845_v16 = vld [vmem:[#allocation4 + $0x144] ss:$16 sps:$4 sm:$0xff]   ;;  %v3855_v29 = vld [vmem:[#allocation4 + $0x180] ss:$16 sps:$4 sm:$0xff]  }
  0x65   :  { %534 = vmatprep.subr.bf16.mxu1 %v3355_v41  ;;  %620 = vmatprep.subr.bf16.mxu0 %v3359_v6  ;;  %v97_v41 = vld [vmem:[#allocation2 + $0x38] sm:$0xff]  ;;  %v3337_v6 = vcombine.high %v117_v60, %v121_v61  ;;  %v3345_v11 = vcombine.high %v125_v3, %v129_v4  ;;  %v3344_v13 = vcombine.low %v125_v3, %v129_v4  ;;  %v3851_v22 = vld [vmem:[#allocation4 + $0x164] ss:$16 sps:$4 sm:$0xff]  }
  0x66   :  { %v3313_v50 = vcombine.high %v93_v40, %v97_v41  ;;  %v3312_v52 = vcombine.low %v93_v40, %v97_v41  ;;  %v3788_v28 = vld [vmem:[#allocation4 + $0xc] ss:$16 sps:$4 sm:$0xff]   ;;  %v3810_v41 = vld [vmem:[#allocation4 + $0x88] ss:$16 sps:$4 sm:$0xff]  }
  0x67   :  { %v3812_v40 = vld [vmem:[#allocation4 + $0x8c] ss:$16 sps:$4 sm:$0xff]   ;;  %v3852_v60 = vld [vmem:[#allocation4 + $0x168] ss:$16 sps:$4 sm:$0xff]  }
  0x68   :  { %535 = vmatpush1.bf16.msra.mxu1 %v3354_v47  ;;  %621 = vmatpush1.bf16.msra.mxu0 %v3358_v12  ;;  %v101_v47 = vld [vmem:[#allocation2 + $0x58] sm:$0xff]  ;;  %v3837_v12 = vld [vmem:[#allocation4 + $0x120] ss:$16 sps:$4 sm:$0xff]  }
  0x69   :  { %536 = vmatprep.subr.bf16.mxu1 %v3363_v51  ;;  %622 = vmatprep.subr.bf16.mxu0 %v3367_v14  ;;  %v3813_v51 = vld [vmem:[#allocation4 + $0xa0] ss:$16 sps:$4 sm:$0xff]   ;;  %v3321_v56 = vcombine.high %v101_v47, %v105_v48  ;;  %v3320_v59 = vcombine.low %v101_v47, %v105_v48  ;;  %v141_v14 = vld [vmem:[#allocation2 + $0x198] sm:$0xff] }
  0x6a   :  { %v3867_v47 = vld [vmem:[#allocation4 + $0x1c0] ss:$16 sps:$4 sm:$0xff]   ;;  %v3828_v48 = vld [vmem:[#allocation4 + $0xe8] ss:$16 sps:$4 sm:$0xff]   ;;  %v3860_v61 = vld [vmem:[#allocation4 + $0x18c] ss:$16 sps:$4 sm:$0xff]  }
  0x6b   :  { %v3870_v3 = vld [vmem:[#allocation4 + $0x1c8] ss:$16 sps:$4 sm:$0xff]   ;;  %v3878_v4 = vld [vmem:[#allocation4 + $0x1ec] ss:$16 sps:$4 sm:$0xff]  }
  0x6c   :  { %537 = vmatpush1.bf16.msra.mxu1 %v3362_v55  ;;  %623 = vmatpush1.bf16.msra.mxu0 %v3366_v19  ;;  %v3821_v55 = vld [vmem:[#allocation4 + $0xc4] ss:$16 sps:$4 sm:$0xff]  }
  0x6d   :  { %565 = vmatprep.subr.bf16.mxu1 %v3309_v58  ;;  %2276 = vmatprep.subr.bf16.mxu0 %v3785_v20  ;;  %v3819_v58 = vld [vmem:[#allocation4 + $0xc0] ss:$16 sps:$4 sm:$0xff]   ;;  %v149_v20 = vld [vmem:[#allocation2 + $0x1d8] sm:$0xff] }
  0x6f   :  { %555 = vmatmul.mubr.bf16.vlgmr.msra.gmra.mrb[0].mxu1 %v4489_v57  ;;  %641 = vmatmul.mubr.bf16.vlgmr.msra.gmra.mrb[0].mxu0 %v4489_v57 }
  0x70   :  { %566 = vmatpush1.bf16.msra.mxu1 %v3308_v1  ;;  %597 = vmatprep.mubr.bf16.mxu1 %v4385_v0  ;;  %v3825_v1 = vld [vmem:[#allocation4 + $0xe0] ss:$16 sps:$4 sm:$0xff]  }
  0x71   :  { %567 = vmatprep.subr.bf16.mxu1 %v3317_v2  ;;  %2277 = vmatpush1.bf16.msra.mxu0 %v3783_v25  ;;  %v3328_v2 = vcombine.low %v109_v53, %v113_v54  ;;  %v3834_v53 = vld [vmem:[#allocation4 + $0x108] ss:$16 sps:$4 sm:$0xff]   ;;  %v3842_v54 = vld [vmem:[#allocation4 + $0x12c] ss:$16 sps:$4 sm:$0xff]  }
  0x72   :  { %2278 = vmatprep.subr.bf16.mxu0 %v3791_v26  ;;  %v3857_v26 = vld [vmem:[#allocation4 + $0x184] ss:$16 sps:$4 sm:$0xff]  }
  0x74   :  { %568 = vmatpush1.bf16.msra.mxu1 %v3316_v9  ;;  %v133_v9 = vld [vmem:[#allocation2 + $0x158] sm:$0xff] }
  0x75   :  { %569 = vmatprep.subr.bf16.mxu1 %v3325_v10  ;;  %2279 = vmatpush1.bf16.msra.mxu0 %v3789_v31  ;;  %v3839_v10 = vld [vmem:[#allocation4 + $0x124] ss:$16 sps:$4 sm:$0xff]  }
  0x76   :  { %2280 = vmatprep.subr.bf16.mxu0 %v3797_v32  ;;  %v3863_v31 = vld [vmem:[#allocation4 + $0x1a4] ss:$16 sps:$4 sm:$0xff]   ;;  %v3786_v32 = vld [vmem:[#allocation4 + $0x8] ss:$16 sps:$4 sm:$0xff]  }
  0x78   :  { %570 = vmatpush1.bf16.msra.mxu1 %v3324_v15  ;;  %v145_v15 = vld [vmem:[#allocation2 + $0x1b8] sm:$0xff] }
  0x79   :  { %571 = vmatprep.subr.bf16.mxu1 %v3333_v17  ;;  %2281 = vmatpush1.bf16.msra.mxu0 %v3795_v37  ;;  %v3361_v23 = vcombine.high %v141_v14, %v145_v15  ;;  %v3360_v25 = vcombine.low %v141_v14, %v145_v15  ;;  %v3798_v37 = vld [vmem:[#allocation4 + $0x48] ss:$16 sps:$4 sm:$0xff]  }
  0x7a   :  { %2282 = vmatprep.subr.bf16.mxu0 %v3803_v38  ;;  %v3806_v38 = vld [vmem:[#allocation4 + $0x6c] ss:$16 sps:$4 sm:$0xff]  }
  0x7c   :  { %572 = vmatpush1.bf16.msra.mxu1 %v3332_v21  ;;  %v153_v21 = vld [vmem:[#allocation2 + $0x1f8] sm:$0xff] }
  0x7d   :  { %573 = vmatprep.subr.bf16.mxu1 %v3341_v24  ;;  %2283 = vmatpush1.bf16.msra.mxu0 %v3801_v43  ;;  %v3849_v24 = vld [vmem:[#allocation4 + $0x160] ss:$16 sps:$4 sm:$0xff]   ;;  %v3816_v43 = vld [vmem:[#allocation4 + $0xa8] ss:$16 sps:$4 sm:$0xff]  }
  0x7e   :  { %2284 = vmatprep.subr.bf16.mxu0 %v3809_v44  ;;  %v3824_v44 = vld [vmem:[#allocation4 + $0xcc] ss:$16 sps:$4 sm:$0xff]  }
  0x80   :  { %574 = vmatpush1.bf16.msra.mxu1 %v3340_v27  ;;  %v3369_v27 = vcombine.high %v149_v20, %v153_v21 }
  0x81   :  { %575 = vmatprep.subr.bf16.mxu1 %v3349_v30  ;;  %2285 = vmatpush1.bf16.msra.mxu0 %v3807_v45  ;;  %v3368_v30 = vcombine.low %v149_v20, %v153_v21  ;;  %v3869_v45 = vld [vmem:[#allocation4 + $0x1c4] ss:$16 sps:$4 sm:$0xff]  }
  0x82   :  { %2286 = vmatprep.subr.bf16.mxu0 %v3815_v49  ;;  %v3875_v49 = vld [vmem:[#allocation4 + $0x1e4] ss:$16 sps:$4 sm:$0xff]  }
  0x84   :  { %576 = vmatpush1.bf16.msra.mxu1 %v3348_v33  ;;  %v3794_v33 = vld [vmem:[#allocation4 + $0x2c] ss:$16 sps:$4 sm:$0xff]  }
  0x85   :  { %577 = vmatprep.subr.bf16.mxu1 %v3357_v36  ;;  %2287 = vmatpush1.bf16.msra.mxu0 %v3813_v51  ;;  %v3800_v36 = vld [vmem:[#allocation4 + $0x4c] ss:$16 sps:$4 sm:$0xff]   ;;  %v3873_v51 = vld [vmem:[#allocation4 + $0x1e0] ss:$16 sps:$4 sm:$0xff]  }
  0x86   :  { %2288 = vmatprep.subr.bf16.mxu0 %v3821_v55  ;;  %v3840_v55 = vld [vmem:[#allocation4 + $0x128] ss:$16 sps:$4 sm:$0xff]  }
  0x88   :  { %578 = vmatpush1.bf16.msra.mxu1 %v3356_v39  ;;  %v3804_v39 = vld [vmem:[#allocation4 + $0x68] ss:$16 sps:$4 sm:$0xff]  }
  0x89   :  { %579 = vmatprep.subr.bf16.mxu1 %v3365_v42  ;;  %2289 = vmatpush1.bf16.msra.mxu0 %v3819_v58  ;;  %v3818_v42 = vld [vmem:[#allocation4 + $0xac] ss:$16 sps:$4 sm:$0xff]   ;;  %v3846_v58 = vld [vmem:[#allocation4 + $0x148] ss:$16 sps:$4 sm:$0xff]  }
  0x8a   :  { %2290 = vmatprep.subr.bf16.mxu0 %v3827_v62  ;;  %v3858_v62 = vld [vmem:[#allocation4 + $0x188] ss:$16 sps:$4 sm:$0xff]  }
  0x8c   :  { %580 = vmatpush1.bf16.msra.mxu1 %v3364_v46  ;;  %v3830_v46 = vld [vmem:[#allocation4 + $0xec] ss:$16 sps:$4 sm:$0xff]  }
  0x8d   :  { %651 = vmatprep.subr.bf16.mxu1 %v3313_v50  ;;  %2291 = vmatpush1.bf16.msra.mxu0 %v3825_v1  ;;  %v3836_v50 = vld [vmem:[#allocation4 + $0x10c] ss:$16 sps:$4 sm:$0xff]   ;;  %v3864_v1 = vld [vmem:[#allocation4 + $0x1a8] ss:$16 sps:$4 sm:$0xff]  }
  0x8e   :  { %2292 = vmatprep.subr.bf16.mxu0 %v3833_v5  ;;  %v3876_v5 = vld [vmem:[#allocation4 + $0x1e8] ss:$16 sps:$4 sm:$0xff]  }
  0x8f   :  { %598 = vmatmul.mubr.bf16.vlgmr.msra.gmra.mrb[4].mxu1 %v4489_v57 }
  0x90   :  { %652 = vmatpush1.bf16.msra.mxu1 %v3312_v52  ;;  %683 = vmatprep.mubr.bf16.mxu1 %v4385_v0  ;;  %v137_v0 = vld [vmem:[#allocation2 + $0x178] sm:$0xff]  ;;  %v3881_v52 = vld [vmem:[#allocation4 + $0x204] ss:$16 sps:$4 sm:$0xff]  }
  0x91   :  { %653 = vmatprep.subr.bf16.mxu1 %v3321_v56  ;;  %v3353_v17 = vcombine.high %v133_v9, %v137_v0  ;;  %2293 = vmatpush1.bf16.msra.mxu0 %v3831_v7  ;;  %v3352_v19 = vcombine.low %v133_v9, %v137_v0  ;;  %v3848_v56 = vld [vmem:[#allocation4 + $0x14c] ss:$16 sps:$4 sm:$0xff]   ;;  %v156_v7 = vlaneseq  ;;  %v4505_v0 = vld [vmem:[%s4578_s2] sm:$0xff] }
  0x92   :  { %2294 = vmatprep.subr.bf16.mxu0 %v3839_v10 }
  0x94   :  { %654 = vmatpush1.bf16.msra.mxu1 %v3320_v59  ;;  %v3854_v59 = vld [vmem:[#allocation4 + $0x16c] ss:$16 sps:$4 sm:$0xff]  }
  0x95   :  { %655 = vmatprep.subr.bf16.mxu1 %v3329_v63  ;;  %2295 = vmatpush1.bf16.msra.mxu0 %v3837_v12  ;;  %v3866_v63 = vld [vmem:[#allocation4 + $0x1ac] ss:$16 sps:$4 sm:$0xff]  }
  0x96   :  { %2296 = vmatprep.subr.bf16.mxu0 %v3845_v16 }
  0x98   :  { %656 = vmatpush1.bf16.msra.mxu1 %v3328_v2  ;;  %v3872_v2 = vld [vmem:[#allocation4 + $0x1cc] ss:$16 sps:$4 sm:$0xff]  }
  0x99   :  { %657 = vmatprep.subr.bf16.mxu1 %v3337_v6  ;;  %2297 = vmatpush1.bf16.msra.mxu0 %v3843_v18  ;;  %v3884_v6 = vld [vmem:[#allocation4 + $0x20c] ss:$16 sps:$4 sm:$0xff]  }
  0x9a   :  { %2298 = vmatprep.subr.bf16.mxu0 %v3851_v22 }
  0x9c   :  { %658 = vmatpush1.bf16.msra.mxu1 %v3336_v8  ;;  %v4497_v8 = vshrl.u32 %v156_v7, 7  ;;  %v3920_v7 = vld [vmem:[#allocation4 + $0x2cc] ss:$16 sps:$4 sm:$0xff]  }
  0x9d   :  { %659 = vmatprep.subr.bf16.mxu1 %v3345_v11  ;;  %2299 = vmatpush1.bf16.msra.mxu0 %v3849_v24 }
  0x9e   :  { %2300 = vmatprep.subr.bf16.mxu0 %v3857_v26  ;;  %v4500_v9 = vsub.s32 0, %v4497_v8  ;;  %v4508_v10 = vsub.s32 1, %v4497_v8 }
  0xa0   :  { %660 = vmatpush1.bf16.msra.mxu1 %v3344_v13  ;;  %v159_v11 = vrot.slane %v4505_v0, %v4500_v9  ;;  %v163_v12 = vrot.slane %v4505_v0, %v4508_v10 }
  0xa1   :  { %661 = vmatprep.subr.bf16.mxu1 %v3353_v17  ;;  %2301 = vmatpush1.bf16.msra.mxu0 %v3855_v29  ;;  %v3879_v29 = vld [vmem:[#allocation4 + $0x200] ss:$16 sps:$4 sm:$0xff]  }
  0xa2   :  { %2302 = vmatprep.subr.bf16.mxu0 %v3863_v31  ;;  %v3887_v31 = vld [vmem:[#allocation4 + $0x224] ss:$16 sps:$4 sm:$0xff]  }
  0xa4   :  { %662 = vmatpush1.bf16.msra.mxu1 %v3352_v19 }
  0xa5   :  { %663 = vmatprep.subr.bf16.mxu1 %v3361_v23  ;;  %2303 = vmatpush1.bf16.msra.mxu0 %v3861_v34 }
  0xa6   :  { %2304 = vmatprep.subr.bf16.mxu0 %v3869_v45 }
  0xa8   :  { %664 = vmatpush1.bf16.msra.mxu1 %v3360_v25  ;;  %v174_v25 = vsub.s32 4, %v4497_v8 }
  0xa9   :  { %665 = vmatprep.subr.bf16.mxu1 %v3369_v27  ;;  %2305 = vmatpush1.bf16.msra.mxu0 %v3867_v47  ;;  %v178_v27 = vsub.s32 5, %v4497_v8 }
  0xaa   :  { %2306 = vmatprep.subr.bf16.mxu0 %v3875_v49  ;;  %v3902_v49 = vld [vmem:[#allocation4 + $0x26c] ss:$16 sps:$4 sm:$0xff]  }
  0xab   :  { %v179_v34 = vrot.slane %v4505_v0, %v178_v27 }
  0xac   :  { %666 = vmatpush1.bf16.msra.mxu1 %v3368_v30  ;;  %v3882_v30 = vld [vmem:[#allocation4 + $0x208] ss:$16 sps:$4 sm:$0xff]  }
  0xad   :  { %2448 = vmatprep.subr.bf16.mxu1 %v3788_v28  ;;  %2307 = vmatpush1.bf16.msra.mxu0 %v3873_v51 }
  0xae   :  { %2319 = vmatprep.subr.bf16.mxu0 %v3881_v52 }
  0xaf   :  { %684 = vmatmul.mubr.bf16.vlgmr.msra.gmra.mrb[8].mxu1 %v4489_v57  ;;  %v3822_v57 = vld [vmem:[#allocation4 + $0xc8] ss:$16 sps:$4 sm:$0xff]  }
  0xb0   :  { %2449 = vmatpush1.bf16.msra.mxu1 %v3786_v32  ;;  %v3890_v32 = vld [vmem:[#allocation4 + $0x22c] ss:$16 sps:$4 sm:$0xff]  }
  0xb1   :  { %2450 = vmatprep.subr.bf16.mxu1 %v3794_v33  ;;  %v175_v33 = vrot.slane %v4505_v0, %v174_v25  ;;  %v3921_v25 = vld [vmem:[#allocation4 + $0x2e0] ss:$16 sps:$4 sm:$0xff]  }
  0xb4   :  { %2451 = vmatpush1.bf16.msra.mxu1 %v3792_v35  ;;  %v3885_v35 = vld [vmem:[#allocation4 + $0x220] ss:$16 sps:$4 sm:$0xff]  }
  0xb5   :  { %2452 = vmatprep.subr.bf16.mxu1 %v3800_v36  ;;  %v3888_v36 = vld [vmem:[#allocation4 + $0x228] ss:$16 sps:$4 sm:$0xff]  }
  0xb8   :  { %2453 = vmatpush1.bf16.msra.mxu1 %v3798_v37  ;;  %v3893_v37 = vld [vmem:[#allocation4 + $0x244] ss:$16 sps:$4 sm:$0xff]  }
  0xb9   :  { %2454 = vmatprep.subr.bf16.mxu1 %v3806_v38  ;;  %v3896_v38 = vld [vmem:[#allocation4 + $0x24c] ss:$16 sps:$4 sm:$0xff]  }
  0xbc   :  { %2455 = vmatpush1.bf16.msra.mxu1 %v3804_v39 }
  0xbd   :  { %2456 = vmatprep.subr.bf16.mxu1 %v3812_v40 }
  0xc0   :  { %2457 = vmatpush1.bf16.msra.mxu1 %v3810_v41 }
  0xc1   :  { %2458 = vmatprep.subr.bf16.mxu1 %v3818_v42 }
  0xc4   :  { %2459 = vmatpush1.bf16.msra.mxu1 %v3816_v43 }
  0xc5   :  { %2460 = vmatprep.subr.bf16.mxu1 %v3824_v44  ;;  %v3891_v44 = vld [vmem:[#allocation4 + $0x240] ss:$16 sps:$4 sm:$0xff]  }
  0xc8   :  { %2461 = vmatpush1.bf16.msra.mxu1 %v3822_v57  ;;  %v3894_v57 = vld [vmem:[#allocation4 + $0x248] ss:$16 sps:$4 sm:$0xff]  }
  0xc9   :  { %2462 = vmatprep.subr.bf16.mxu1 %v3830_v46 }
  0xcc   :  { %2463 = vmatpush1.bf16.msra.mxu1 %v3828_v48  ;;  %v3899_v48 = vld [vmem:[#allocation4 + $0x264] ss:$16 sps:$4 sm:$0xff]  }
  0xcd   :  { %2464 = vmatprep.subr.bf16.mxu1 %v3836_v50 }
  0xd0   :  { %2465 = vmatpush1.bf16.msra.mxu1 %v3834_v53 }
  0xd1   :  { %2466 = vmatprep.subr.bf16.mxu1 %v3842_v54  ;;  %v3897_v54 = vld [vmem:[#allocation4 + $0x260] ss:$16 sps:$4 sm:$0xff]  }
  0xd4   :  { %2467 = vmatpush1.bf16.msra.mxu1 %v3840_v55  ;;  %v3900_v55 = vld [vmem:[#allocation4 + $0x268] ss:$16 sps:$4 sm:$0xff]  }
  0xd5   :  { %2468 = vmatprep.subr.bf16.mxu1 %v3848_v56 }
  0xd8   :  { %2469 = vmatpush1.bf16.msra.mxu1 %v3846_v58  ;;  %v3905_v58 = vld [vmem:[#allocation4 + $0x284] ss:$16 sps:$4 sm:$0xff]  }
  0xd9   :  { %2470 = vmatprep.subr.bf16.mxu1 %v3854_v59  ;;  %v3908_v59 = vld [vmem:[#allocation4 + $0x28c] ss:$16 sps:$4 sm:$0xff]  }
  0xdc   :  { %2471 = vmatpush1.bf16.msra.mxu1 %v3852_v60 }
  0xdd   :  { %2472 = vmatprep.subr.bf16.mxu1 %v3860_v61  ;;  %v3903_v61 = vld [vmem:[#allocation4 + $0x280] ss:$16 sps:$4 sm:$0xff]  }
  0xe0   :  { %2473 = vmatpush1.bf16.msra.mxu1 %v3858_v62  ;;  %v3906_v62 = vld [vmem:[#allocation4 + $0x288] ss:$16 sps:$4 sm:$0xff]  }
  0xe1   :  { %2474 = vmatprep.subr.bf16.mxu1 %v3866_v63  ;;  %v3911_v63 = vld [vmem:[#allocation4 + $0x2a4] ss:$16 sps:$4 sm:$0xff]  }
  0xe4   :  { %2475 = vmatpush1.bf16.msra.mxu1 %v3864_v1  ;;  %v3914_v1 = vld [vmem:[#allocation4 + $0x2ac] ss:$16 sps:$4 sm:$0xff]  }
  0xe5   :  { %2476 = vmatprep.subr.bf16.mxu1 %v3872_v2  ;;  %v166_v2 = vsub.s32 2, %v4497_v8 }
  0xe8   :  { %2477 = vmatpush1.bf16.msra.mxu1 %v3870_v3  ;;  %v170_v3 = vsub.s32 3, %v4497_v8 }
  0xe9   :  { %2478 = vmatprep.subr.bf16.mxu1 %v3878_v4  ;;  %v3909_v4 = vld [vmem:[#allocation4 + $0x2a0] ss:$16 sps:$4 sm:$0xff]  }
  0xec   :  { %2479 = vmatpush1.bf16.msra.mxu1 %v3876_v5  ;;  %v3912_v5 = vld [vmem:[#allocation4 + $0x2a8] ss:$16 sps:$4 sm:$0xff]  }
  0xed   :  { %2491 = vmatprep.subr.bf16.mxu1 %v3884_v6  ;;  %v3917_v6 = vld [vmem:[#allocation4 + $0x2c4] ss:$16 sps:$4 sm:$0xff]  }
 0x142   :  { %v556_v13 = vpop.f32.mrb[0].mxu1  ;;  %v642_v39 = vpop.f32.mrb[0].mxu0 }
 0x143   :  { %v557_v14 = vadd.f32 %v556_v13, %v159_v11  ;;  %v558_v15 = vpop.f32.mrb[1].mxu1  ;;  %v643_v40 = vadd.f32 %v642_v39, %v175_v33  ;;  %v644_v41 = vpop.f32.mrb[1].mxu0  ;;  %v3915_v13 = vld [vmem:[#allocation4 + $0x2c0] ss:$16 sps:$4 sm:$0xff]  }
 0x144   :  { %v559_v16 = vadd.f32 %v558_v15, %v163_v12  ;;  %v560_v17 = vpop.f32.mrb[2].mxu1  ;;  %v645_v42 = vadd.f32 %v644_v41, %v179_v34  ;;  %v646_v43 = vpop.f32.mrb[2].mxu0  ;;  %v3933_v39 = vld [vmem:[#allocation4 + $0x320] ss:$16 sps:$4 sm:$0xff]   ;;  %v3941_v41 = vld [vmem:[#allocation4 + $0x344] ss:$16 sps:$4 sm:$0xff]  }
 0x145   :  { %v561_v18 = vadd.f32 %v560_v17, %v159_v11  ;;  %v562_v19 = vpop.f32.mrb[3].mxu1  ;;  %v694_v21 = vmax.f32 %v557_v14, 0.0  ;;  %v698_v45 = vmax.f32 %v643_v40, 0.0  ;;  %v647_v46 = vadd.f32 %v646_v43, %v175_v33  ;;  %v648_v47 = vpop.f32.mrb[3].mxu0  ;;  %v3918_v14 = vld [vmem:[#allocation4 + $0x2c8] ss:$16 sps:$4 sm:$0xff]  }
 0x146   :  { %v563_v20 = vadd.f32 %v562_v19, %v163_v12  ;;  %v695_v23 = vmax.f32 %v559_v16, 0.0  ;;  %v699_v50 = vmax.f32 %v645_v42, 0.0  ;;  %v649_v51 = vadd.f32 %v648_v47, %v179_v34  ;;  %v3923_v16 = vld [vmem:[#allocation4 + $0x2e4] ss:$16 sps:$4 sm:$0xff]   ;;  %v3926_v17 = vld [vmem:[#allocation4 + $0x2ec] ss:$16 sps:$4 sm:$0xff]  }
 0x147   :  { %v702_v22 = vmax.f32 %v561_v18, 0.0  ;;  %v706_v52 = vmax.f32 %v647_v46, 0.0  ;;  %v167_v11 = vrot.slane %v4505_v0, %v166_v2  ;;  %v171_v12 = vrot.slane %v4505_v0, %v170_v3  ;;  %v3927_v34 = vld [vmem:[#allocation4 + $0x300] ss:$16 sps:$4 sm:$0xff]   ;;  %v3936_v40 = vld [vmem:[#allocation4 + $0x328] ss:$16 sps:$4 sm:$0xff]  }
 0x148   :  { %v703_v24 = vmax.f32 %v563_v20, 0.0  ;;  %v707_v53 = vmax.f32 %v649_v51, 0.0  ;;  %v3944_v42 = vld [vmem:[#allocation4 + $0x34c] ss:$16 sps:$4 sm:$0xff]   ;;  %v3939_v43 = vld [vmem:[#allocation4 + $0x340] ss:$16 sps:$4 sm:$0xff]  }
 0x149   :  { %v710_v26 = vpack.c.bf16 %v702_v22, %v694_v21  ;;  %v4518_v56 = vpack.c.bf16 %v706_v52, %v698_v45  ;;  %v3950_v45 = vld [vmem:[#allocation4 + $0x36c] ss:$16 sps:$4 sm:$0xff]   ;;  %v3945_v46 = vld [vmem:[#allocation4 + $0x360] ss:$16 sps:$4 sm:$0xff]   ;;  %v3948_v47 = vld [vmem:[#allocation4 + $0x368] ss:$16 sps:$4 sm:$0xff]  }
 0x14a   :  { %v711_v28 = vpack.c.bf16 %v703_v24, %v695_v23  ;;  %v4520_v60 = vpack.c.bf16 %v707_v53, %v699_v50  ;;  %v3951_v50 = vld [vmem:[#allocation4 + $0x380] ss:$16 sps:$4 sm:$0xff]   ;;  %v3954_v51 = vld [vmem:[#allocation4 + $0x388] ss:$16 sps:$4 sm:$0xff]   ;;  %v3959_v52 = vld [vmem:[#allocation4 + $0x3a4] ss:$16 sps:$4 sm:$0xff]  }
 0x14b   :  { %v3962_v53 = vld [vmem:[#allocation4 + $0x3ac] ss:$16 sps:$4 sm:$0xff]  }
 0x14c   :  { %2308 = vmatprep.mubr.bf16.mxu0 %v711_v28  ;;  %2480 = vmatprep.mubr.bf16.mxu1 %v711_v28 }
 0x14d   :  { %2309 = vmatmul.mubr.bf16.vlgmr.msra.gmra.mrb[4].mxu0 %v710_v26  ;;  %2481 = vmatmul.mubr.bf16.vlgmr.msra.gmra.mrb[12].mxu1 %v710_v26  ;;  %v3924_v26 = vld [vmem:[#allocation4 + $0x2e8] ss:$16 sps:$4 sm:$0xff]  }
 0x14e   :  { %2320 = vmatpush1.bf16.msra.mxu0 %v3879_v29  ;;  %2492 = vmatpush1.bf16.msra.mxu1 %v3882_v30  ;;  %v3929_v29 = vld [vmem:[#allocation4 + $0x304] ss:$16 sps:$4 sm:$0xff]   ;;  %v3932_v30 = vld [vmem:[#allocation4 + $0x30c] ss:$16 sps:$4 sm:$0xff]  }
 0x14f   :  { %2321 = vmatprep.subr.bf16.mxu0 %v3887_v31  ;;  %2493 = vmatprep.subr.bf16.mxu1 %v3890_v32 }
 0x152   :  { %2322 = vmatpush1.bf16.msra.mxu0 %v3885_v35  ;;  %2494 = vmatpush1.bf16.msra.mxu1 %v3888_v36  ;;  %v3930_v35 = vld [vmem:[#allocation4 + $0x308] ss:$16 sps:$4 sm:$0xff]  }
 0x153   :  { %2323 = vmatprep.subr.bf16.mxu0 %v3893_v37  ;;  %2495 = vmatprep.subr.bf16.mxu1 %v3896_v38  ;;  %v3935_v37 = vld [vmem:[#allocation4 + $0x324] ss:$16 sps:$4 sm:$0xff]   ;;  %v3938_v38 = vld [vmem:[#allocation4 + $0x32c] ss:$16 sps:$4 sm:$0xff]  }
 0x156   :  { %2324 = vmatpush1.bf16.msra.mxu0 %v3891_v44  ;;  %2496 = vmatpush1.bf16.msra.mxu1 %v3894_v57  ;;  %v3942_v44 = vld [vmem:[#allocation4 + $0x348] ss:$16 sps:$4 sm:$0xff]   ;;  %v3947_v57 = vld [vmem:[#allocation4 + $0x364] ss:$16 sps:$4 sm:$0xff]  }
 0x157   :  { %2325 = vmatprep.subr.bf16.mxu0 %v3899_v48  ;;  %2497 = vmatprep.subr.bf16.mxu1 %v3902_v49  ;;  %v3953_v48 = vld [vmem:[#allocation4 + $0x384] ss:$16 sps:$4 sm:$0xff]   ;;  %v3956_v49 = vld [vmem:[#allocation4 + $0x38c] ss:$16 sps:$4 sm:$0xff]  }
 0x15a   :  { %2326 = vmatpush1.bf16.msra.mxu0 %v3897_v54  ;;  %2498 = vmatpush1.bf16.msra.mxu1 %v3900_v55  ;;  %v3957_v54 = vld [vmem:[#allocation4 + $0x3a0] ss:$16 sps:$4 sm:$0xff]   ;;  %v3960_v55 = vld [vmem:[#allocation4 + $0x3a8] ss:$16 sps:$4 sm:$0xff]  }
 0x15b   :  { %2327 = vmatprep.subr.bf16.mxu0 %v3905_v58  ;;  %2499 = vmatprep.subr.bf16.mxu1 %v3908_v59  ;;  %v182_v58 = vsub.s32 6, %v4497_v8  ;;  %v186_v59 = vsub.s32 7, %v4497_v8 }
 0x15e   :  { %2328 = vmatpush1.bf16.msra.mxu0 %v3903_v61  ;;  %2500 = vmatpush1.bf16.msra.mxu1 %v3906_v62  ;;  %v3965_v61 = vld [vmem:[#allocation4 + $0x3c4] ss:$16 sps:$4 sm:$0xff]   ;;  %v3968_v62 = vld [vmem:[#allocation4 + $0x3cc] ss:$16 sps:$4 sm:$0xff]  }
 0x15f   :  { %2329 = vmatprep.subr.bf16.mxu0 %v3911_v63  ;;  %2501 = vmatprep.subr.bf16.mxu1 %v3914_v1  ;;  %v183_v63 = vrot.slane %v4505_v0, %v182_v58  ;;  %v187_v1 = vrot.slane %v4505_v0, %v186_v59  ;;  %v3972_v0 = vld [vmem:[#allocation4 + $0x3e8] ss:$16 sps:$4 sm:$0xff]   ;;  %v4025_v58 = vld [vmem:[#allocation4 + $0x504] ss:$16 sps:$4 sm:$0xff]   ;;  %v4028_v59 = vld [vmem:[#allocation4 + $0x50c] ss:$16 sps:$4 sm:$0xff]  }
 0x162   :  { %2330 = vmatpush1.bf16.msra.mxu0 %v3909_v4  ;;  %2502 = vmatpush1.bf16.msra.mxu1 %v3912_v5  ;;  %v599_v15 = vpop.f32.mrb[4].mxu1  ;;  %v3963_v4 = vld [vmem:[#allocation4 + $0x3c0] ss:$16 sps:$4 sm:$0xff]   ;;  %v3966_v5 = vld [vmem:[#allocation4 + $0x3c8] ss:$16 sps:$4 sm:$0xff]  }
 0x163   :  { %2331 = vmatprep.subr.bf16.mxu0 %v3917_v6  ;;  %2503 = vmatprep.subr.bf16.mxu1 %v3920_v7  ;;  %v600_v18 = vadd.f32 %v599_v15, %v167_v11  ;;  %v601_v19 = vpop.f32.mrb[5].mxu1  ;;  %v3971_v7 = vld [vmem:[#allocation4 + $0x3e4] ss:$16 sps:$4 sm:$0xff]  }
 0x164   :  { %v602_v20 = vadd.f32 %v601_v19, %v171_v12  ;;  %v603_v21 = vpop.f32.mrb[6].mxu1  ;;  %v3969_v19 = vld [vmem:[#allocation4 + $0x3e0] ss:$16 sps:$4 sm:$0xff]  }
 0x165   :  { %v696_v22 = vmax.f32 %v600_v18, 0.0  ;;  %v604_v23 = vadd.f32 %v603_v21, %v167_v11  ;;  %v605_v24 = vpop.f32.mrb[7].mxu1  ;;  %v3974_v11 = vld [vmem:[#allocation4 + $0x3ec] ss:$16 sps:$4 sm:$0xff]  }
 0x166   :  { %2332 = vmatpush1.bf16.msra.mxu0 %v3915_v13  ;;  %2504 = vmatpush1.bf16.msra.mxu1 %v3918_v14  ;;  %v697_v27 = vmax.f32 %v602_v20, 0.0  ;;  %v606_v28 = vadd.f32 %v605_v24, %v171_v12 }
 0x167   :  { %2333 = vmatprep.subr.bf16.mxu0 %v3923_v16  ;;  %2505 = vmatprep.subr.bf16.mxu1 %v3926_v17  ;;  %v704_v31 = vmax.f32 %v604_v23, 0.0  ;;  %v3980_v23 = vld [vmem:[#allocation4 + $0x40c] ss:$16 sps:$4 sm:$0xff]  }
 0x168   :  { %v705_v32 = vmax.f32 %v606_v28, 0.0  ;;  %v3978_v28 = vld [vmem:[#allocation4 + $0x408] ss:$16 sps:$4 sm:$0xff]  }
 0x169   :  { %v4530_v33 = vpack.c.bf16 %v704_v31, %v696_v22  ;;  %v3977_v22 = vld [vmem:[#allocation4 + $0x404] ss:$16 sps:$4 sm:$0xff]   ;;  %v3986_v31 = vld [vmem:[#allocation4 + $0x42c] ss:$16 sps:$4 sm:$0xff]  }
 0x16a   :  { %2334 = vmatpush1.bf16.msra.mxu0 %v3921_v25  ;;  %2506 = vmatpush1.bf16.msra.mxu1 %v3924_v26  ;;  %v713_v36 = vpack.c.bf16 %v705_v32, %v697_v27  ;;  %v3975_v27 = vld [vmem:[#allocation4 + $0x400] ss:$16 sps:$4 sm:$0xff]  }
 0x16b   :  { %2335 = vmatprep.subr.bf16.mxu0 %v3929_v29  ;;  %2507 = vmatprep.subr.bf16.mxu1 %v3932_v30  ;;  %v3983_v30 = vld [vmem:[#allocation4 + $0x424] ss:$16 sps:$4 sm:$0xff]   ;;  %v3981_v32 = vld [vmem:[#allocation4 + $0x420] ss:$16 sps:$4 sm:$0xff]  }
 0x16c   :  { %2351 = vmatprep.mubr.bf16.mxu0 %v713_v36  ;;  %2523 = vmatprep.mubr.bf16.mxu1 %v713_v36  ;;  %v3992_v36 = vld [vmem:[#allocation4 + $0x44c] ss:$16 sps:$4 sm:$0xff]  }
 0x16e   :  { %2336 = vmatpush1.bf16.msra.mxu0 %v3927_v34  ;;  %2508 = vmatpush1.bf16.msra.mxu1 %v3930_v35  ;;  %v3984_v34 = vld [vmem:[#allocation4 + $0x428] ss:$16 sps:$4 sm:$0xff]   ;;  %v3989_v35 = vld [vmem:[#allocation4 + $0x444] ss:$16 sps:$4 sm:$0xff]  }
 0x16f   :  { %2337 = vmatprep.subr.bf16.mxu0 %v3935_v37  ;;  %2509 = vmatprep.subr.bf16.mxu1 %v3938_v38  ;;  %v3987_v37 = vld [vmem:[#allocation4 + $0x440] ss:$16 sps:$4 sm:$0xff]   ;;  %v3990_v38 = vld [vmem:[#allocation4 + $0x448] ss:$16 sps:$4 sm:$0xff]  }
 0x172   :  { %2338 = vmatpush1.bf16.msra.mxu0 %v3933_v39  ;;  %2510 = vmatpush1.bf16.msra.mxu1 %v3936_v40  ;;  %v3995_v39 = vld [vmem:[#allocation4 + $0x464] ss:$16 sps:$4 sm:$0xff]   ;;  %v3993_v40 = vld [vmem:[#allocation4 + $0x460] ss:$16 sps:$4 sm:$0xff]  }
 0x173   :  { %2339 = vmatprep.subr.bf16.mxu0 %v3941_v41  ;;  %2511 = vmatprep.subr.bf16.mxu1 %v3944_v42  ;;  %v3996_v41 = vld [vmem:[#allocation4 + $0x468] ss:$16 sps:$4 sm:$0xff]   ;;  %v4001_v42 = vld [vmem:[#allocation4 + $0x484] ss:$16 sps:$4 sm:$0xff]  }
 0x176   :  { %2340 = vmatpush1.bf16.msra.mxu0 %v3939_v43  ;;  %2512 = vmatpush1.bf16.msra.mxu1 %v3942_v44  ;;  %v4004_v43 = vld [vmem:[#allocation4 + $0x48c] ss:$16 sps:$4 sm:$0xff]   ;;  %v3999_v44 = vld [vmem:[#allocation4 + $0x480] ss:$16 sps:$4 sm:$0xff]  }
 0x177   :  { %2341 = vmatprep.subr.bf16.mxu0 %v3947_v57  ;;  %2513 = vmatprep.subr.bf16.mxu1 %v3950_v45  ;;  %v4007_v57 = vld [vmem:[#allocation4 + $0x4a4] ss:$16 sps:$4 sm:$0xff]   ;;  %v4010_v45 = vld [vmem:[#allocation4 + $0x4ac] ss:$16 sps:$4 sm:$0xff]  }
 0x17a   :  { %2342 = vmatpush1.bf16.msra.mxu0 %v3945_v46  ;;  %2514 = vmatpush1.bf16.msra.mxu1 %v3948_v47  ;;  %v4005_v46 = vld [vmem:[#allocation4 + $0x4a0] ss:$16 sps:$4 sm:$0xff]   ;;  %v4008_v47 = vld [vmem:[#allocation4 + $0x4a8] ss:$16 sps:$4 sm:$0xff]  }
 0x17b   :  { %2343 = vmatprep.subr.bf16.mxu0 %v3953_v48  ;;  %2515 = vmatprep.subr.bf16.mxu1 %v3956_v49  ;;  %v4013_v48 = vld [vmem:[#allocation4 + $0x4c4] ss:$16 sps:$4 sm:$0xff]   ;;  %v4016_v49 = vld [vmem:[#allocation4 + $0x4cc] ss:$16 sps:$4 sm:$0xff]  }
 0x17e   :  { %2344 = vmatpush1.bf16.msra.mxu0 %v3951_v50  ;;  %2516 = vmatpush1.bf16.msra.mxu1 %v3954_v51  ;;  %v4011_v50 = vld [vmem:[#allocation4 + $0x4c0] ss:$16 sps:$4 sm:$0xff]   ;;  %v4014_v51 = vld [vmem:[#allocation4 + $0x4c8] ss:$16 sps:$4 sm:$0xff]  }
 0x17f   :  { %2345 = vmatprep.subr.bf16.mxu0 %v3959_v52  ;;  %2517 = vmatprep.subr.bf16.mxu1 %v3962_v53  ;;  %v4019_v52 = vld [vmem:[#allocation4 + $0x4e4] ss:$16 sps:$4 sm:$0xff]   ;;  %v4022_v53 = vld [vmem:[#allocation4 + $0x4ec] ss:$16 sps:$4 sm:$0xff]  }
 0x182   :  { %2346 = vmatpush1.bf16.msra.mxu0 %v3957_v54  ;;  %2518 = vmatpush1.bf16.msra.mxu1 %v3960_v55  ;;  %v685_v6 = vpop.f32.mrb[8].mxu1  ;;  %v4017_v54 = vld [vmem:[#allocation4 + $0x4e0] ss:$16 sps:$4 sm:$0xff]   ;;  %v4020_v55 = vld [vmem:[#allocation4 + $0x4e8] ss:$16 sps:$4 sm:$0xff]  }
 0x183   :  { %2347 = vmatprep.subr.bf16.mxu0 %v3965_v61  ;;  %2519 = vmatprep.subr.bf16.mxu1 %v3968_v62  ;;  %v686_v12 = vadd.f32 %v685_v6, %v183_v63  ;;  %v687_v13 = vpop.f32.mrb[9].mxu1  ;;  %v4023_v61 = vld [vmem:[#allocation4 + $0x500] ss:$16 sps:$4 sm:$0xff]   ;;  %v4026_v62 = vld [vmem:[#allocation4 + $0x508] ss:$16 sps:$4 sm:$0xff]  }
 0x184   :  { %v688_v14 = vadd.f32 %v687_v13, %v187_v1  ;;  %v689_v15 = vpop.f32.mrb[10].mxu1  ;;  %v4037_v6 = vld [vmem:[#allocation4 + $0x544] ss:$16 sps:$4 sm:$0xff]  }
 0x185   :  { %v700_v16 = vmax.f32 %v686_v12, 0.0  ;;  %v690_v17 = vadd.f32 %v689_v15, %v183_v63  ;;  %v691_v18 = vpop.f32.mrb[11].mxu1  ;;  %v4031_v63 = vld [vmem:[#allocation4 + $0x524] ss:$16 sps:$4 sm:$0xff]   ;;  %v4038_v12 = vld [vmem:[#allocation4 + $0x548] ss:$16 sps:$4 sm:$0xff]  }
 0x186   :  { %2348 = vmatpush1.bf16.msra.mxu0 %v3963_v4  ;;  %2520 = vmatpush1.bf16.msra.mxu1 %v3966_v5  ;;  %v701_v20 = vmax.f32 %v688_v14, 0.0  ;;  %v692_v21 = vadd.f32 %v691_v18, %v187_v1  ;;  %v4034_v1 = vld [vmem:[#allocation4 + $0x52c] ss:$16 sps:$4 sm:$0xff]   ;;  %v4029_v4 = vld [vmem:[#allocation4 + $0x520] ss:$16 sps:$4 sm:$0xff]  }
 0x187   :  { %2349 = vmatprep.subr.bf16.mxu0 %v3971_v7  ;;  %2521 = vmatprep.subr.bf16.mxu1 %v3974_v11  ;;  %v708_v24 = vmax.f32 %v690_v17, 0.0  ;;  %v4032_v5 = vld [vmem:[#allocation4 + $0x528] ss:$16 sps:$4 sm:$0xff]   ;;  %v4040_v7 = vld [vmem:[#allocation4 + $0x54c] ss:$16 sps:$4 sm:$0xff]  }
 0x188   :  { %v709_v25 = vmax.f32 %v692_v21, 0.0  ;;  %v4035_v11 = vld [vmem:[#allocation4 + $0x540] ss:$16 sps:$4 sm:$0xff]   ;;  %v4043_v13 = vld [vmem:[#allocation4 + $0x564] ss:$16 sps:$4 sm:$0xff]  }
 0x189   :  { %v4536_v26 = vpack.c.bf16 %v708_v24, %v700_v16  ;;  %v4046_v14 = vld [vmem:[#allocation4 + $0x56c] ss:$16 sps:$4 sm:$0xff]   ;;  %v4041_v15 = vld [vmem:[#allocation4 + $0x560] ss:$16 sps:$4 sm:$0xff]   ;;  %v4044_v16 = vld [vmem:[#allocation4 + $0x568] ss:$16 sps:$4 sm:$0xff]  }
 0x18a   :  { %2350 = vmatpush1.bf16.msra.mxu0 %v3969_v19  ;;  %2522 = vmatpush1.bf16.msra.mxu1 %v3972_v0  ;;  %v4538_v29 = vpack.c.bf16 %v709_v25, %v701_v20  ;;  %v4049_v17 = vld [vmem:[#allocation4 + $0x584] ss:$16 sps:$4 sm:$0xff]   ;;  %v4052_v18 = vld [vmem:[#allocation4 + $0x58c] ss:$16 sps:$4 sm:$0xff]   ;;  %v4047_v19 = vld [vmem:[#allocation4 + $0x580] ss:$16 sps:$4 sm:$0xff]  }
 0x18b   :  { %2362 = vmatprep.subr.bf16.mxu0 %v3977_v22  ;;  %2534 = vmatprep.subr.bf16.mxu1 %v3980_v23  ;;  %v4050_v0 = vld [vmem:[#allocation4 + $0x588] ss:$16 sps:$4 sm:$0xff]   ;;  %v4055_v20 = vld [vmem:[#allocation4 + $0x5a4] ss:$16 sps:$4 sm:$0xff]   ;;  %v4058_v21 = vld [vmem:[#allocation4 + $0x5ac] ss:$16 sps:$4 sm:$0xff]  }
 0x18c   :  { %v4053_v22 = vld [vmem:[#allocation4 + $0x5a0] ss:$16 sps:$4 sm:$0xff]   ;;  %v4056_v23 = vld [vmem:[#allocation4 + $0x5a8] ss:$16 sps:$4 sm:$0xff]   ;;  %v4061_v24 = vld [vmem:[#allocation4 + $0x5c4] ss:$16 sps:$4 sm:$0xff]  }
 0x18d   :  { %2352 = vmatmul.mubr.bf16.vlgmr.msra.gmra.mrb[4].mxu0 %v4530_v33  ;;  %2524 = vmatmul.mubr.bf16.vlgmr.msra.gmra.mrb[12].mxu1 %v4530_v33  ;;  %v3998_v33 = vld [vmem:[#allocation4 + $0x46c] ss:$16 sps:$4 sm:$0xff]  }
 0x18e   :  { %2363 = vmatpush1.bf16.msra.mxu0 %v3975_v27  ;;  %2535 = vmatpush1.bf16.msra.mxu1 %v3978_v28  ;;  %v4064_v25 = vld [vmem:[#allocation4 + $0x5cc] ss:$16 sps:$4 sm:$0xff]   ;;  %v4059_v27 = vld [vmem:[#allocation4 + $0x5c0] ss:$16 sps:$4 sm:$0xff]   ;;  %v4062_v28 = vld [vmem:[#allocation4 + $0x5c8] ss:$16 sps:$4 sm:$0xff]  }
 0x18f   :  { %2364 = vmatprep.subr.bf16.mxu0 %v3983_v30  ;;  %2536 = vmatprep.subr.bf16.mxu1 %v3986_v31  ;;  %v4067_v30 = vld [vmem:[#allocation4 + $0x5e4] ss:$16 sps:$4 sm:$0xff]   ;;  %v4070_v31 = vld [vmem:[#allocation4 + $0x5ec] ss:$16 sps:$4 sm:$0xff]  }
 0x190   :  { %2394 = vmatprep.mubr.bf16.mxu0 %v4520_v60  ;;  %2566 = vmatprep.mubr.bf16.mxu1 %v4520_v60  ;;  %v4002_v60 = vld [vmem:[#allocation4 + $0x488] ss:$16 sps:$4 sm:$0xff]  }
 0x192   :  { %2365 = vmatpush1.bf16.msra.mxu0 %v3981_v32  ;;  %2537 = vmatpush1.bf16.msra.mxu1 %v3984_v34  ;;  %v4065_v32 = vld [vmem:[#allocation4 + $0x5e0] ss:$16 sps:$4 sm:$0xff]   ;;  %v4068_v34 = vld [vmem:[#allocation4 + $0x5e8] ss:$16 sps:$4 sm:$0xff]  }
 0x193   :  { %2366 = vmatprep.subr.bf16.mxu0 %v3989_v35  ;;  %2538 = vmatprep.subr.bf16.mxu1 %v3992_v36  ;;  %v4073_v35 = vld [vmem:[#allocation4 + $0x604] ss:$16 sps:$4 sm:$0xff]   ;;  %v4076_v36 = vld [vmem:[#allocation4 + $0x60c] ss:$16 sps:$4 sm:$0xff]  }
 0x196   :  { %2367 = vmatpush1.bf16.msra.mxu0 %v3987_v37  ;;  %2539 = vmatpush1.bf16.msra.mxu1 %v3990_v38  ;;  %v4071_v37 = vld [vmem:[#allocation4 + $0x600] ss:$16 sps:$4 sm:$0xff]   ;;  %v4074_v38 = vld [vmem:[#allocation4 + $0x608] ss:$16 sps:$4 sm:$0xff]  }
 0x197   :  { %2368 = vmatprep.subr.bf16.mxu0 %v3995_v39  ;;  %2540 = vmatprep.subr.bf16.mxu1 %v3998_v33  ;;  %v4079_v39 = vld [vmem:[#allocation4 + $0x624] ss:$16 sps:$4 sm:$0xff]   ;;  %v4082_v33 = vld [vmem:[#allocation4 + $0x62c] ss:$16 sps:$4 sm:$0xff]  }
 0x19a   :  { %2369 = vmatpush1.bf16.msra.mxu0 %v3993_v40  ;;  %2541 = vmatpush1.bf16.msra.mxu1 %v3996_v41  ;;  %v4077_v40 = vld [vmem:[#allocation4 + $0x620] ss:$16 sps:$4 sm:$0xff]   ;;  %v4080_v41 = vld [vmem:[#allocation4 + $0x628] ss:$16 sps:$4 sm:$0xff]  }
 0x19b   :  { %2370 = vmatprep.subr.bf16.mxu0 %v4001_v42  ;;  %2542 = vmatprep.subr.bf16.mxu1 %v4004_v43  ;;  %v4085_v42 = vld [vmem:[#allocation4 + $0x644] ss:$16 sps:$4 sm:$0xff]   ;;  %v4088_v43 = vld [vmem:[#allocation4 + $0x64c] ss:$16 sps:$4 sm:$0xff]  }
 0x19e   :  { %2371 = vmatpush1.bf16.msra.mxu0 %v3999_v44  ;;  %2543 = vmatpush1.bf16.msra.mxu1 %v4002_v60  ;;  %v4083_v44 = vld [vmem:[#allocation4 + $0x640] ss:$16 sps:$4 sm:$0xff]   ;;  %v4086_v60 = vld [vmem:[#allocation4 + $0x648] ss:$16 sps:$4 sm:$0xff]  }
 0x19f   :  { %2372 = vmatprep.subr.bf16.mxu0 %v4007_v57  ;;  %2544 = vmatprep.subr.bf16.mxu1 %v4010_v45  ;;  %v4091_v57 = vld [vmem:[#allocation4 + $0x664] ss:$16 sps:$4 sm:$0xff]   ;;  %v4089_v45 = vld [vmem:[#allocation4 + $0x660] ss:$16 sps:$4 sm:$0xff]  }
 0x1a2   :  { %2373 = vmatpush1.bf16.msra.mxu0 %v4005_v46  ;;  %2545 = vmatpush1.bf16.msra.mxu1 %v4008_v47  ;;  %v4092_v46 = vld [vmem:[#allocation4 + $0x668] ss:$16 sps:$4 sm:$0xff]   ;;  %v4097_v47 = vld [vmem:[#allocation4 + $0x684] ss:$16 sps:$4 sm:$0xff]  }
 0x1a3   :  { %2374 = vmatprep.subr.bf16.mxu0 %v4013_v48  ;;  %2546 = vmatprep.subr.bf16.mxu1 %v4016_v49  ;;  %v4100_v48 = vld [vmem:[#allocation4 + $0x68c] ss:$16 sps:$4 sm:$0xff]   ;;  %v4095_v49 = vld [vmem:[#allocation4 + $0x680] ss:$16 sps:$4 sm:$0xff]  }
 0x1a6   :  { %2375 = vmatpush1.bf16.msra.mxu0 %v4011_v50  ;;  %2547 = vmatpush1.bf16.msra.mxu1 %v4014_v51  ;;  %v4103_v50 = vld [vmem:[#allocation4 + $0x6a4] ss:$16 sps:$4 sm:$0xff]   ;;  %v4106_v51 = vld [vmem:[#allocation4 + $0x6ac] ss:$16 sps:$4 sm:$0xff]  }
 0x1a7   :  { %2376 = vmatprep.subr.bf16.mxu0 %v4019_v52  ;;  %2548 = vmatprep.subr.bf16.mxu1 %v4022_v53  ;;  %v4101_v52 = vld [vmem:[#allocation4 + $0x6a0] ss:$16 sps:$4 sm:$0xff]   ;;  %v4104_v53 = vld [vmem:[#allocation4 + $0x6a8] ss:$16 sps:$4 sm:$0xff]  }
 0x1aa   :  { %2377 = vmatpush1.bf16.msra.mxu0 %v4017_v54  ;;  %2549 = vmatpush1.bf16.msra.mxu1 %v4020_v55  ;;  %v4109_v54 = vld [vmem:[#allocation4 + $0x6c4] ss:$16 sps:$4 sm:$0xff]   ;;  %v4112_v55 = vld [vmem:[#allocation4 + $0x6cc] ss:$16 sps:$4 sm:$0xff]  }
 0x1ab   :  { %2378 = vmatprep.subr.bf16.mxu0 %v4025_v58  ;;  %2550 = vmatprep.subr.bf16.mxu1 %v4028_v59  ;;  %v4107_v58 = vld [vmem:[#allocation4 + $0x6c0] ss:$16 sps:$4 sm:$0xff]   ;;  %v4110_v59 = vld [vmem:[#allocation4 + $0x6c8] ss:$16 sps:$4 sm:$0xff]  }
 0x1ae   :  { %2379 = vmatpush1.bf16.msra.mxu0 %v4023_v61  ;;  %2551 = vmatpush1.bf16.msra.mxu1 %v4026_v62  ;;  %v4115_v61 = vld [vmem:[#allocation4 + $0x6e4] ss:$16 sps:$4 sm:$0xff]   ;;  %v4118_v62 = vld [vmem:[#allocation4 + $0x6ec] ss:$16 sps:$4 sm:$0xff]  }
 0x1af   :  { %2380 = vmatprep.subr.bf16.mxu0 %v4031_v63  ;;  %2552 = vmatprep.subr.bf16.mxu1 %v4034_v1  ;;  %v4113_v63 = vld [vmem:[#allocation4 + $0x6e0] ss:$16 sps:$4 sm:$0xff]   ;;  %v4116_v1 = vld [vmem:[#allocation4 + $0x6e8] ss:$16 sps:$4 sm:$0xff]  }
 0x1b2   :  { %2381 = vmatpush1.bf16.msra.mxu0 %v4029_v4  ;;  %2553 = vmatpush1.bf16.msra.mxu1 %v4032_v5  ;;  %v4121_v4 = vld [vmem:[#allocation4 + $0x704] ss:$16 sps:$4 sm:$0xff]   ;;  %v4124_v5 = vld [vmem:[#allocation4 + $0x70c] ss:$16 sps:$4 sm:$0xff]  }
 0x1b3   :  { %2382 = vmatprep.subr.bf16.mxu0 %v4037_v6  ;;  %2554 = vmatprep.subr.bf16.mxu1 %v4040_v7  ;;  %v4119_v6 = vld [vmem:[#allocation4 + $0x700] ss:$16 sps:$4 sm:$0xff]   ;;  %v4122_v7 = vld [vmem:[#allocation4 + $0x708] ss:$16 sps:$4 sm:$0xff]  }
 0x1b6   :  { %2383 = vmatpush1.bf16.msra.mxu0 %v4035_v11  ;;  %2555 = vmatpush1.bf16.msra.mxu1 %v4038_v12  ;;  %v4127_v11 = vld [vmem:[#allocation4 + $0x724] ss:$16 sps:$4 sm:$0xff]   ;;  %v4130_v12 = vld [vmem:[#allocation4 + $0x72c] ss:$16 sps:$4 sm:$0xff]  }
 0x1b7   :  { %2384 = vmatprep.subr.bf16.mxu0 %v4043_v13  ;;  %2556 = vmatprep.subr.bf16.mxu1 %v4046_v14  ;;  %v4125_v13 = vld [vmem:[#allocation4 + $0x720] ss:$16 sps:$4 sm:$0xff]   ;;  %v4128_v14 = vld [vmem:[#allocation4 + $0x728] ss:$16 sps:$4 sm:$0xff]  }
 0x1ba   :  { %2385 = vmatpush1.bf16.msra.mxu0 %v4041_v15  ;;  %2557 = vmatpush1.bf16.msra.mxu1 %v4044_v16  ;;  %v4133_v15 = vld [vmem:[#allocation4 + $0x744] ss:$16 sps:$4 sm:$0xff]   ;;  %v4136_v16 = vld [vmem:[#allocation4 + $0x74c] ss:$16 sps:$4 sm:$0xff]  }
 0x1bb   :  { %2386 = vmatprep.subr.bf16.mxu0 %v4049_v17  ;;  %2558 = vmatprep.subr.bf16.mxu1 %v4052_v18  ;;  %v4131_v17 = vld [vmem:[#allocation4 + $0x740] ss:$16 sps:$4 sm:$0xff]   ;;  %v4134_v18 = vld [vmem:[#allocation4 + $0x748] ss:$16 sps:$4 sm:$0xff]  }
 0x1be   :  { %2387 = vmatpush1.bf16.msra.mxu0 %v4047_v19  ;;  %2559 = vmatpush1.bf16.msra.mxu1 %v4050_v0  ;;  %v4139_v19 = vld [vmem:[#allocation4 + $0x764] ss:$16 sps:$4 sm:$0xff]   ;;  %v4142_v0 = vld [vmem:[#allocation4 + $0x76c] ss:$16 sps:$4 sm:$0xff]  }
 0x1bf   :  { %2388 = vmatprep.subr.bf16.mxu0 %v4055_v20  ;;  %2560 = vmatprep.subr.bf16.mxu1 %v4058_v21  ;;  %v4137_v20 = vld [vmem:[#allocation4 + $0x760] ss:$16 sps:$4 sm:$0xff]   ;;  %v4140_v21 = vld [vmem:[#allocation4 + $0x768] ss:$16 sps:$4 sm:$0xff]  }
 0x1c2   :  { %2389 = vmatpush1.bf16.msra.mxu0 %v4053_v22  ;;  %2561 = vmatpush1.bf16.msra.mxu1 %v4056_v23  ;;  %v4145_v22 = vld [vmem:[#allocation4 + $0x784] ss:$16 sps:$4 sm:$0xff]   ;;  %v4148_v23 = vld [vmem:[#allocation4 + $0x78c] ss:$16 sps:$4 sm:$0xff]  }
 0x1c3   :  { %2390 = vmatprep.subr.bf16.mxu0 %v4061_v24  ;;  %2562 = vmatprep.subr.bf16.mxu1 %v4064_v25  ;;  %v4143_v24 = vld [vmem:[#allocation4 + $0x780] ss:$16 sps:$4 sm:$0xff]   ;;  %v4146_v25 = vld [vmem:[#allocation4 + $0x788] ss:$16 sps:$4 sm:$0xff]  }
 0x1c6   :  { %2391 = vmatpush1.bf16.msra.mxu0 %v4059_v27  ;;  %2563 = vmatpush1.bf16.msra.mxu1 %v4062_v28  ;;  %v4151_v27 = vld [vmem:[#allocation4 + $0x7a4] ss:$16 sps:$4 sm:$0xff]   ;;  %v4154_v28 = vld [vmem:[#allocation4 + $0x7ac] ss:$16 sps:$4 sm:$0xff]  }
 0x1c7   :  { %2392 = vmatprep.subr.bf16.mxu0 %v4067_v30  ;;  %2564 = vmatprep.subr.bf16.mxu1 %v4070_v31  ;;  %v4149_v30 = vld [vmem:[#allocation4 + $0x7a0] ss:$16 sps:$4 sm:$0xff]   ;;  %v4152_v31 = vld [vmem:[#allocation4 + $0x7a8] ss:$16 sps:$4 sm:$0xff]  }
 0x1ca   :  { %2393 = vmatpush1.bf16.msra.mxu0 %v4065_v32  ;;  %2565 = vmatpush1.bf16.msra.mxu1 %v4068_v34  ;;  %v4157_v32 = vld [vmem:[#allocation4 + $0x7c4] ss:$16 sps:$4 sm:$0xff]   ;;  %v4160_v34 = vld [vmem:[#allocation4 + $0x7cc] ss:$16 sps:$4 sm:$0xff]  }
 0x1cb   :  { %2405 = vmatprep.subr.bf16.mxu0 %v4073_v35  ;;  %2577 = vmatprep.subr.bf16.mxu1 %v4076_v36  ;;  %v4155_v35 = vld [vmem:[#allocation4 + $0x7c0] ss:$16 sps:$4 sm:$0xff]   ;;  %v4158_v36 = vld [vmem:[#allocation4 + $0x7c8] ss:$16 sps:$4 sm:$0xff]  }
 0x1cd   :  { %2395 = vmatmul.mubr.bf16.vlgmr.msra.gmra.mrb[4].mxu0 %v4518_v56  ;;  %2567 = vmatmul.mubr.bf16.vlgmr.msra.gmra.mrb[12].mxu1 %v4518_v56  ;;  %v4094_v56 = vld [vmem:[#allocation4 + $0x66c] ss:$16 sps:$4 sm:$0xff]  }
 0x1ce   :  { %2406 = vmatpush1.bf16.msra.mxu0 %v4071_v37  ;;  %2578 = vmatpush1.bf16.msra.mxu1 %v4074_v38  ;;  %v4163_v37 = vld [vmem:[#allocation4 + $0x7e4] ss:$16 sps:$4 sm:$0xff]   ;;  %v4166_v38 = vld [vmem:[#allocation4 + $0x7ec] ss:$16 sps:$4 sm:$0xff]  }
 0x1cf   :  { %2407 = vmatprep.subr.bf16.mxu0 %v4079_v39  ;;  %2579 = vmatprep.subr.bf16.mxu1 %v4082_v33  ;;  %v4161_v39 = vld [vmem:[#allocation4 + $0x7e0] ss:$16 sps:$4 sm:$0xff]   ;;  %v4164_v33 = vld [vmem:[#allocation4 + $0x7e8] ss:$16 sps:$4 sm:$0xff]  }
 0x1d0   :  { %2437 = vmatprep.mubr.bf16.mxu0 %v4538_v29  ;;  %2609 = vmatprep.mubr.bf16.mxu1 %v4538_v29  ;;  %v4098_v29 = vld [vmem:[#allocation4 + $0x688] ss:$16 sps:$4 sm:$0xff]  }
 0x1d2   :  { %2408 = vmatpush1.bf16.msra.mxu0 %v4077_v40  ;;  %2580 = vmatpush1.bf16.msra.mxu1 %v4080_v41  ;;  %v4169_v40 = vld [vmem:[#allocation6 + $0x4] ss:$8 sps:$4 sm:$0xff]   ;;  %v4167_v41 = vld [vmem:[#allocation6] ss:$8 sps:$4 sm:$0xff]  }
 0x1d3   :  { %2409 = vmatprep.subr.bf16.mxu0 %v4085_v42  ;;  %2581 = vmatprep.subr.bf16.mxu1 %v4088_v43  ;;  %v4172_v42 = vld [vmem:[#allocation6 + $0x14] ss:$8 sps:$4 sm:$0xff]   ;;  %v4170_v43 = vld [vmem:[#allocation6 + $0x10] ss:$8 sps:$4 sm:$0xff]  }
 0x1d6   :  { %2410 = vmatpush1.bf16.msra.mxu0 %v4083_v44  ;;  %2582 = vmatpush1.bf16.msra.mxu1 %v4086_v60  ;;  %v4175_v44 = vld [vmem:[#allocation6 + $0x24] ss:$8 sps:$4 sm:$0xff]   ;;  %v4173_v60 = vld [vmem:[#allocation6 + $0x20] ss:$8 sps:$4 sm:$0xff]  }
 0x1d7   :  { %2411 = vmatprep.subr.bf16.mxu0 %v4091_v57  ;;  %2583 = vmatprep.subr.bf16.mxu1 %v4094_v56  ;;  %v4178_v57 = vld [vmem:[#allocation6 + $0x34] ss:$8 sps:$4 sm:$0xff]   ;;  %v4176_v56 = vld [vmem:[#allocation6 + $0x30] ss:$8 sps:$4 sm:$0xff]  }
 0x1da   :  { %2412 = vmatpush1.bf16.msra.mxu0 %v4089_v45  ;;  %2584 = vmatpush1.bf16.msra.mxu1 %v4092_v46  ;;  %v4181_v45 = vld [vmem:[#allocation6 + $0x44] ss:$8 sps:$4 sm:$0xff]   ;;  %v4179_v46 = vld [vmem:[#allocation6 + $0x40] ss:$8 sps:$4 sm:$0xff]  }
 0x1db   :  { %2413 = vmatprep.subr.bf16.mxu0 %v4097_v47  ;;  %2585 = vmatprep.subr.bf16.mxu1 %v4100_v48  ;;  %v4184_v47 = vld [vmem:[#allocation6 + $0x54] ss:$8 sps:$4 sm:$0xff]   ;;  %v4182_v48 = vld [vmem:[#allocation6 + $0x50] ss:$8 sps:$4 sm:$0xff]  }
 0x1de   :  { %2414 = vmatpush1.bf16.msra.mxu0 %v4095_v49  ;;  %2586 = vmatpush1.bf16.msra.mxu1 %v4098_v29  ;;  %v4185_v49 = vld [vmem:[#allocation6 + $0x60] ss:$8 sps:$4 sm:$0xff]   ;;  %v4190_v29 = vld [vmem:[#allocation6 + $0x74] ss:$8 sps:$4 sm:$0xff]  }
 0x1df   :  { %2415 = vmatprep.subr.bf16.mxu0 %v4103_v50  ;;  %2587 = vmatprep.subr.bf16.mxu1 %v4106_v51  ;;  %v4188_v50 = vld [vmem:[#allocation6 + $0x70] ss:$8 sps:$4 sm:$0xff]   ;;  %v4193_v51 = vld [vmem:[#allocation6 + $0x84] ss:$8 sps:$4 sm:$0xff]  }
 0x1e2   :  { %2416 = vmatpush1.bf16.msra.mxu0 %v4101_v52  ;;  %2588 = vmatpush1.bf16.msra.mxu1 %v4104_v53  ;;  %v4191_v52 = vld [vmem:[#allocation6 + $0x80] ss:$8 sps:$4 sm:$0xff]   ;;  %v4196_v53 = vld [vmem:[#allocation6 + $0x94] ss:$8 sps:$4 sm:$0xff]  }
 0x1e3   :  { %2417 = vmatprep.subr.bf16.mxu0 %v4109_v54  ;;  %2589 = vmatprep.subr.bf16.mxu1 %v4112_v55  ;;  %v4194_v54 = vld [vmem:[#allocation6 + $0x90] ss:$8 sps:$4 sm:$0xff]   ;;  %v4199_v55 = vld [vmem:[#allocation6 + $0xa4] ss:$8 sps:$4 sm:$0xff]  }
 0x1e6   :  { %2418 = vmatpush1.bf16.msra.mxu0 %v4107_v58  ;;  %2590 = vmatpush1.bf16.msra.mxu1 %v4110_v59  ;;  %v4197_v58 = vld [vmem:[#allocation6 + $0xa0] ss:$8 sps:$4 sm:$0xff]   ;;  %v4202_v59 = vld [vmem:[#allocation6 + $0xb4] ss:$8 sps:$4 sm:$0xff]  }
 0x1e7   :  { %2419 = vmatprep.subr.bf16.mxu0 %v4115_v61  ;;  %2591 = vmatprep.subr.bf16.mxu1 %v4118_v62  ;;  %v4200_v61 = vld [vmem:[#allocation6 + $0xb0] ss:$8 sps:$4 sm:$0xff]   ;;  %v4205_v62 = vld [vmem:[#allocation6 + $0xc4] ss:$8 sps:$4 sm:$0xff]  }
 0x1ea   :  { %2420 = vmatpush1.bf16.msra.mxu0 %v4113_v63  ;;  %2592 = vmatpush1.bf16.msra.mxu1 %v4116_v1  ;;  %v4203_v63 = vld [vmem:[#allocation6 + $0xc0] ss:$8 sps:$4 sm:$0xff]   ;;  %v4208_v1 = vld [vmem:[#allocation6 + $0xd4] ss:$8 sps:$4 sm:$0xff]  }
 0x1eb   :  { %2421 = vmatprep.subr.bf16.mxu0 %v4121_v4  ;;  %2593 = vmatprep.subr.bf16.mxu1 %v4124_v5  ;;  %v4206_v4 = vld [vmem:[#allocation6 + $0xd0] ss:$8 sps:$4 sm:$0xff]   ;;  %v4211_v5 = vld [vmem:[#allocation6 + $0xe4] ss:$8 sps:$4 sm:$0xff]  }
 0x1ee   :  { %2422 = vmatpush1.bf16.msra.mxu0 %v4119_v6  ;;  %2594 = vmatpush1.bf16.msra.mxu1 %v4122_v7  ;;  %v4209_v6 = vld [vmem:[#allocation6 + $0xe0] ss:$8 sps:$4 sm:$0xff]   ;;  %v4214_v7 = vld [vmem:[#allocation6 + $0xf4] ss:$8 sps:$4 sm:$0xff]  }
 0x1ef   :  { %2423 = vmatprep.subr.bf16.mxu0 %v4127_v11  ;;  %2595 = vmatprep.subr.bf16.mxu1 %v4130_v12  ;;  %v4212_v11 = vld [vmem:[#allocation6 + $0xf0] ss:$8 sps:$4 sm:$0xff]   ;;  %v4217_v12 = vld [vmem:[#allocation6 + $0x104] ss:$8 sps:$4 sm:$0xff]  }
 0x1f2   :  { %2424 = vmatpush1.bf16.msra.mxu0 %v4125_v13  ;;  %2596 = vmatpush1.bf16.msra.mxu1 %v4128_v14  ;;  %v4263_v13 = vld [vmem:[#allocation7 + $0x40] sm:$0xff]  }
 0x1f3   :  { %2425 = vmatprep.subr.bf16.mxu0 %v4133_v15  ;;  %2597 = vmatprep.subr.bf16.mxu1 %v4136_v16  ;;  %v4264_v14 = vld [vmem:[#allocation7] sm:$0xff]   ;;  %v4265_v15 = vld [vmem:[#allocation7 + $0x48] sm:$0xff]  }
 0x1f4   :  { %v4266_v16 = vld [vmem:[#allocation7 + $0x8] sm:$0xff]  }
 0x1f6   :  { %2426 = vmatpush1.bf16.msra.mxu0 %v4131_v17  ;;  %2598 = vmatpush1.bf16.msra.mxu1 %v4134_v18  ;;  %v4267_v17 = vld [vmem:[#allocation7 + $0x50] sm:$0xff]  }
 0x1f7   :  { %2427 = vmatprep.subr.bf16.mxu0 %v4139_v19  ;;  %2599 = vmatprep.subr.bf16.mxu1 %v4142_v0  ;;  %v4268_v18 = vld [vmem:[#allocation7 + $0x10] sm:$0xff]   ;;  %v4269_v19 = vld [vmem:[#allocation7 + $0x58] sm:$0xff]  }
 0x1f8   :  { %v4270_v0 = vld [vmem:[#allocation7 + $0x18] sm:$0xff]  }
 0x1fa   :  { %2428 = vmatpush1.bf16.msra.mxu0 %v4137_v20  ;;  %2600 = vmatpush1.bf16.msra.mxu1 %v4140_v21  ;;  %v4271_v20 = vld [vmem:[#allocation7 + $0x60] sm:$0xff]  }
 0x1fb   :  { %2429 = vmatprep.subr.bf16.mxu0 %v4145_v22  ;;  %2601 = vmatprep.subr.bf16.mxu1 %v4148_v23  ;;  %v4272_v21 = vld [vmem:[#allocation7 + $0x20] sm:$0xff]   ;;  %v4273_v22 = vld [vmem:[#allocation7 + $0x68] sm:$0xff]  }
 0x1fc   :  { %v974_v23 = vld [vmem:[%s4580_s4] sm:$0xf] }
 0x1fe   :  { %2430 = vmatpush1.bf16.msra.mxu0 %v4143_v24  ;;  %2602 = vmatpush1.bf16.msra.mxu1 %v4146_v25  ;;  %v979_v24 = vrot.slane %v974_v23, %v4500_v9  ;;  %v987_v25 = vrot.slane %v974_v23, %v166_v2 }
 0x1ff   :  { %2431 = vmatprep.subr.bf16.mxu0 %v4151_v27  ;;  %2603 = vmatprep.subr.bf16.mxu1 %v4154_v28  ;;  %v983_v27 = vrot.slane %v974_v23, %v4508_v10  ;;  %v991_v28 = vrot.slane %v974_v23, %v170_v3  ;;  %v4262_v23 = vld [vmem:[#allocation6 + $0x1f4] ss:$8 sps:$4 sm:$0xff]  }
 0x202   :  { %2432 = vmatpush1.bf16.msra.mxu0 %v4149_v30  ;;  %2604 = vmatpush1.bf16.msra.mxu1 %v4152_v31 }
 0x203   :  { %2433 = vmatprep.subr.bf16.mxu0 %v4157_v32  ;;  %2605 = vmatprep.subr.bf16.mxu1 %v4160_v34 }
 0x206   :  { %2434 = vmatpush1.bf16.msra.mxu0 %v4155_v35  ;;  %2606 = vmatpush1.bf16.msra.mxu1 %v4158_v36 }
 0x207   :  { %2435 = vmatprep.subr.bf16.mxu0 %v4163_v37  ;;  %2607 = vmatprep.subr.bf16.mxu1 %v4166_v38 }
 0x20a   :  { %2436 = vmatpush1.bf16.msra.mxu0 %v4161_v39  ;;  %2608 = vmatpush1.bf16.msra.mxu1 %v4164_v33 }
 0x20b   :  { %3028 = vmatprep.subr.bf16.mxu0 %v4169_v40  ;;  %3707 = vmatprep.subr.bf16.mxu1 %v4263_v13  ;;  %v4242_v13 = vld [vmem:[#allocation6 + $0x190] ss:$8 sps:$4 sm:$0xff]  }
 0x20d   :  { %2438 = vmatmul.mubr.bf16.vlgmr.msra.gmra.mrb[4].mxu0 %v4536_v26  ;;  %2610 = vmatmul.mubr.bf16.vlgmr.msra.gmra.mrb[12].mxu1 %v4536_v26  ;;  %v4187_v26 = vld [vmem:[#allocation6 + $0x64] ss:$8 sps:$4 sm:$0xff]  }
 0x20e   :  { %3029 = vmatpush1.bf16.msra.mxu0 %v4167_v41  ;;  %3708 = vmatpush3.bf16.msra.mxu1 %v4264_v14  ;;  %v4247_v14 = vld [vmem:[#allocation6 + $0x1a4] ss:$8 sps:$4 sm:$0xff]  }
 0x20f   :  { %3030 = vmatprep.subr.bf16.mxu0 %v4172_v42  ;;  %3709 = vmatprep.subr.bf16.mxu1 %v4265_v15  ;;  %v4245_v15 = vld [vmem:[#allocation6 + $0x1a0] ss:$8 sps:$4 sm:$0xff]  }
 0x212   :  { %3031 = vmatpush1.bf16.msra.mxu0 %v4170_v43  ;;  %3710 = vmatpush3.bf16.msra.mxu1 %v4266_v16  ;;  %v4250_v16 = vld [vmem:[#allocation6 + $0x1b4] ss:$8 sps:$4 sm:$0xff]  }
 0x213   :  { %3032 = vmatprep.subr.bf16.mxu0 %v4175_v44  ;;  %3711 = vmatprep.subr.bf16.mxu1 %v4267_v17  ;;  %v4248_v17 = vld [vmem:[#allocation6 + $0x1b0] ss:$8 sps:$4 sm:$0xff]  }
 0x216   :  { %3033 = vmatpush1.bf16.msra.mxu0 %v4173_v60  ;;  %3712 = vmatpush3.bf16.msra.mxu1 %v4268_v18  ;;  %v4253_v18 = vld [vmem:[#allocation6 + $0x1c4] ss:$8 sps:$4 sm:$0xff]  }
 0x217   :  { %3034 = vmatprep.subr.bf16.mxu0 %v4178_v57  ;;  %3713 = vmatprep.subr.bf16.mxu1 %v4269_v19  ;;  %v4251_v19 = vld [vmem:[#allocation6 + $0x1c0] ss:$8 sps:$4 sm:$0xff]  }
 0x21a   :  { %3035 = vmatpush1.bf16.msra.mxu0 %v4176_v56  ;;  %3714 = vmatpush3.bf16.msra.mxu1 %v4270_v0  ;;  %v4256_v0 = vld [vmem:[#allocation6 + $0x1d4] ss:$8 sps:$4 sm:$0xff]  }
 0x21b   :  { %3036 = vmatprep.subr.bf16.mxu0 %v4181_v45  ;;  %3715 = vmatprep.subr.bf16.mxu1 %v4271_v20  ;;  %v4254_v20 = vld [vmem:[#allocation6 + $0x1d0] ss:$8 sps:$4 sm:$0xff]  }
 0x21e   :  { %3037 = vmatpush1.bf16.msra.mxu0 %v4179_v46  ;;  %3716 = vmatpush3.bf16.msra.mxu1 %v4272_v21  ;;  %v4259_v21 = vld [vmem:[#allocation6 + $0x1e4] ss:$8 sps:$4 sm:$0xff]  }
 0x21f   :  { %3038 = vmatprep.subr.bf16.mxu0 %v4184_v47  ;;  %3717 = vmatprep.subr.bf16.mxu1 %v4273_v22  ;;  %v4257_v22 = vld [vmem:[#allocation6 + $0x1e0] ss:$8 sps:$4 sm:$0xff]  }
 0x222   :  { %3039 = vmatpush1.bf16.msra.mxu0 %v4182_v48 }
 0x223   :  { %3040 = vmatprep.subr.bf16.mxu0 %v4187_v26 }
 0x226   :  { %3041 = vmatpush1.bf16.msra.mxu0 %v4185_v49 }
 0x227   :  { %3042 = vmatprep.subr.bf16.mxu0 %v4190_v29 }
 0x22a   :  { %3043 = vmatpush1.bf16.msra.mxu0 %v4188_v50  ;;  %v4215_v50 = vld [vmem:[#allocation6 + $0x100] ss:$8 sps:$4 sm:$0xff]  }
 0x22b   :  { %3044 = vmatprep.subr.bf16.mxu0 %v4193_v51  ;;  %v4220_v51 = vld [vmem:[#allocation6 + $0x114] ss:$8 sps:$4 sm:$0xff]  }
 0x22e   :  { %3045 = vmatpush1.bf16.msra.mxu0 %v4191_v52  ;;  %v4218_v52 = vld [vmem:[#allocation6 + $0x110] ss:$8 sps:$4 sm:$0xff]  }
 0x22f   :  { %3046 = vmatprep.subr.bf16.mxu0 %v4196_v53  ;;  %v4223_v53 = vld [vmem:[#allocation6 + $0x124] ss:$8 sps:$4 sm:$0xff]  }
 0x232   :  { %3047 = vmatpush1.bf16.msra.mxu0 %v4194_v54  ;;  %v4221_v54 = vld [vmem:[#allocation6 + $0x120] ss:$8 sps:$4 sm:$0xff]  }
 0x233   :  { %3048 = vmatprep.subr.bf16.mxu0 %v4199_v55  ;;  %v4226_v55 = vld [vmem:[#allocation6 + $0x134] ss:$8 sps:$4 sm:$0xff]  }
 0x236   :  { %3049 = vmatpush1.bf16.msra.mxu0 %v4197_v58  ;;  %v4224_v58 = vld [vmem:[#allocation6 + $0x130] ss:$8 sps:$4 sm:$0xff]  }
 0x237   :  { %3050 = vmatprep.subr.bf16.mxu0 %v4202_v59  ;;  %v4229_v59 = vld [vmem:[#allocation6 + $0x144] ss:$8 sps:$4 sm:$0xff]  }
 0x23a   :  { %3051 = vmatpush1.bf16.msra.mxu0 %v4200_v61  ;;  %v4227_v61 = vld [vmem:[#allocation6 + $0x140] ss:$8 sps:$4 sm:$0xff]  }
 0x23b   :  { %3052 = vmatprep.subr.bf16.mxu0 %v4205_v62  ;;  %v4232_v62 = vld [vmem:[#allocation6 + $0x154] ss:$8 sps:$4 sm:$0xff]  }
 0x23e   :  { %3053 = vmatpush1.bf16.msra.mxu0 %v4203_v63  ;;  %v4230_v63 = vld [vmem:[#allocation6 + $0x150] ss:$8 sps:$4 sm:$0xff]  }
 0x23f   :  { %3054 = vmatprep.subr.bf16.mxu0 %v4208_v1  ;;  %v4235_v1 = vld [vmem:[#allocation6 + $0x164] ss:$8 sps:$4 sm:$0xff]  }
 0x242   :  { %3055 = vmatpush1.bf16.msra.mxu0 %v4206_v4  ;;  %v4233_v4 = vld [vmem:[#allocation6 + $0x160] ss:$8 sps:$4 sm:$0xff]  }
 0x243   :  { %3056 = vmatprep.subr.bf16.mxu0 %v4211_v5  ;;  %v4238_v5 = vld [vmem:[#allocation6 + $0x174] ss:$8 sps:$4 sm:$0xff]  }
 0x246   :  { %3057 = vmatpush1.bf16.msra.mxu0 %v4209_v6  ;;  %v4236_v6 = vld [vmem:[#allocation6 + $0x170] ss:$8 sps:$4 sm:$0xff]  }
 0x247   :  { %3058 = vmatprep.subr.bf16.mxu0 %v4214_v7  ;;  %v4241_v7 = vld [vmem:[#allocation6 + $0x184] ss:$8 sps:$4 sm:$0xff]  }
 0x24a   :  { %3059 = vmatpush1.bf16.msra.mxu0 %v4212_v11  ;;  %v4239_v11 = vld [vmem:[#allocation6 + $0x180] ss:$8 sps:$4 sm:$0xff]  }
 0x24b   :  { %3071 = vmatprep.subr.bf16.mxu0 %v4217_v12  ;;  %v4244_v12 = vld [vmem:[#allocation6 + $0x194] ss:$8 sps:$4 sm:$0xff]  }
 0x2e0   :  { %v2439_v30 = vpop.f32.mrb[4].mxu0  ;;  %v2611_v31 = vpop.f32.mrb[12].mxu1 }
 0x2e1   :  { %v3729_v32 = vadd.f32 %v2439_v30, %v979_v24  ;;  %v3733_v34 = vadd.f32 %v2611_v31, %v987_v25  ;;  %v2441_v35 = vpop.f32.mrb[5].mxu0  ;;  %v2613_v36 = vpop.f32.mrb[13].mxu1  ;;  %v4277_v30 = vld [vmem:[#allocation7 + $0x78] sm:$0xff]  }
 0x2e2   :  { %v3730_v37 = vadd.f32 %v2441_v35, %v983_v27  ;;  %v3734_v38 = vadd.f32 %v2613_v36, %v991_v28  ;;  %v2443_v39 = vpop.f32.mrb[6].mxu0  ;;  %v2615_v33 = vpop.f32.mrb[14].mxu1  ;;  %v4278_v31 = vld [vmem:[#allocation7 + $0x38] sm:$0xff]  }
 0x2e3   :  { %v3731_v40 = vadd.f32 %v2443_v39, %v979_v24  ;;  %v3735_v41 = vadd.f32 %v2615_v33, %v987_v25  ;;  %v2445_v42 = vpop.f32.mrb[7].mxu0  ;;  %v2617_v43 = vpop.f32.mrb[15].mxu1  ;;  %v2620_v60 = vmax.f32 %v3729_v32, 0.0  ;;  %v2622_v57 = vmax.f32 %v3733_v34, 0.0  ;;  %v4260_v24 = vld [vmem:[#allocation6 + $0x1f0] ss:$8 sps:$4 sm:$0xff]  }
 0x2e4   :  { %v3732_v2 = vadd.f32 %v2445_v42, %v983_v27  ;;  %v3736_v44 = vadd.f32 %v2617_v43, %v991_v28  ;;  %v2621_v56 = vmax.f32 %v3730_v37, 0.0  ;;  %v2623_v45 = vmax.f32 %v3734_v38, 0.0  ;;  %v4274_v25 = vld [vmem:[#allocation7 + $0x28] sm:$0xff]   ;;  %v4275_v27 = vld [vmem:[#allocation7 + $0x70] sm:$0xff]   ;;  %v2696_v32 = vld [vmem:[%s4582_s6] sm:$0x3] }
 0x2e5   :  { %v2624_v8 = vmax.f32 %v3731_v40, 0.0  ;;  %v2626_v3 = vmax.f32 %v3735_v41, 0.0  ;;  %3718 = vmatpush3.bf16.msra.mxu1 %v4274_v25  ;;  %v4276_v28 = vld [vmem:[#allocation7 + $0x30] sm:$0xff]   ;;  %v2701_v34 = vrot.slane %v2696_v32, %v4500_v9  ;;  %v2705_v35 = vrot.slane %v2696_v32, %v4508_v10  ;;  %v3690_v9 = vld [vmem:[%s4584_s8] ss:$0 sm:$0xff] }
 0x2e6   :  { %v2625_v46 = vmax.f32 %v3732_v2, 0.0  ;;  %v2627_v47 = vmax.f32 %v3736_v44, 0.0  ;;  %3719 = vmatprep.subr.bf16.mxu1 %v4275_v27 }
 0x2e7   :  { %v2628_v48 = vpack.c.bf16 %v2624_v8, %v2620_v60  ;;  %v4559_v26 = vpack.c.bf16 %v2626_v3, %v2622_v57 }
 0x2e8   :  { %v2629_v49 = vpack.c.bf16 %v2625_v46, %v2621_v56  ;;  %v2631_v29 = vpack.c.bf16 %v2627_v47, %v2623_v45 }
 0x2e9   :  { %3720 = vmatpush3.bf16.msra.mxu1 %v4276_v28 }
 0x2ea   :  { %3060 = vmatprep.mubr.bf16.mxu0 %v2629_v49  ;;  %3721 = vmatprep.subr.bf16.mxu1 %v4277_v30 }
 0x2eb   :  { %3061 = vmatmul.mubr.bf16.vlgmr.msra.gmra.mrb[8].mxu0 %v2628_v48 }
 0x2ec   :  { %3072 = vmatpush1.bf16.msra.mxu0 %v4215_v50  ;;  %3103 = vmatprep.mubr.bf16.mxu0 %v2631_v29 }
 0x2ed   :  { %3073 = vmatprep.subr.bf16.mxu0 %v4220_v51  ;;  %3722 = vmatpush3.bf16.msra.mxu1 %v4278_v31 }
 0x2f0   :  { %3074 = vmatpush1.bf16.msra.mxu0 %v4218_v52 }
 0x2f1   :  { %3075 = vmatprep.subr.bf16.mxu0 %v4223_v53 }
 0x2f4   :  { %3076 = vmatpush1.bf16.msra.mxu0 %v4221_v54 }
 0x2f5   :  { %3077 = vmatprep.subr.bf16.mxu0 %v4226_v55 }
 0x2f8   :  { %3078 = vmatpush1.bf16.msra.mxu0 %v4224_v58 }
 0x2f9   :  { %3079 = vmatprep.subr.bf16.mxu0 %v4229_v59 }
 0x2fc   :  { %3080 = vmatpush1.bf16.msra.mxu0 %v4227_v61 }
 0x2fd   :  { %3081 = vmatprep.subr.bf16.mxu0 %v4232_v62 }
 0x300   :  { %3082 = vmatpush1.bf16.msra.mxu0 %v4230_v63 }
 0x301   :  { %3083 = vmatprep.subr.bf16.mxu0 %v4235_v1 }
 0x304   :  { %3084 = vmatpush1.bf16.msra.mxu0 %v4233_v4 }
 0x305   :  { %3085 = vmatprep.subr.bf16.mxu0 %v4238_v5 }
 0x308   :  { %3086 = vmatpush1.bf16.msra.mxu0 %v4236_v6 }
 0x309   :  { %3087 = vmatprep.subr.bf16.mxu0 %v4241_v7 }
 0x30c   :  { %3088 = vmatpush1.bf16.msra.mxu0 %v4239_v11 }
 0x30d   :  { %3089 = vmatprep.subr.bf16.mxu0 %v4244_v12 }
 0x310   :  { %3090 = vmatpush1.bf16.msra.mxu0 %v4242_v13 }
 0x311   :  { %3091 = vmatprep.subr.bf16.mxu0 %v4247_v14 }
 0x314   :  { %3092 = vmatpush1.bf16.msra.mxu0 %v4245_v15 }
 0x315   :  { %3093 = vmatprep.subr.bf16.mxu0 %v4250_v16 }
 0x318   :  { %3094 = vmatpush1.bf16.msra.mxu0 %v4248_v17 }
 0x319   :  { %3095 = vmatprep.subr.bf16.mxu0 %v4253_v18 }
 0x31c   :  { %3096 = vmatpush1.bf16.msra.mxu0 %v4251_v19 }
 0x31d   :  { %3097 = vmatprep.subr.bf16.mxu0 %v4256_v0 }
 0x320   :  { %3098 = vmatpush1.bf16.msra.mxu0 %v4254_v20 }
 0x321   :  { %3099 = vmatprep.subr.bf16.mxu0 %v4259_v21 }
 0x324   :  { %3100 = vmatpush1.bf16.msra.mxu0 %v4257_v22 }
 0x325   :  { %3101 = vmatprep.subr.bf16.mxu0 %v4262_v23 }
 0x328   :  { %3102 = vmatpush1.bf16.msra.mxu0 %v4260_v24 }
 0x32b   :  { %3104 = vmatmul.mubr.bf16.vlgmr.msra.gmra.mrb[8].mxu0 %v4559_v26 }
 0x3fe   :  { %v3105_v36 = vpop.f32.mrb[8].mxu0 }
 0x3ff   :  { %v3737_v37 = vadd.f32 %v3105_v36, %v2701_v34  ;;  %v3107_v38 = vpop.f32.mrb[9].mxu0 }
 0x400   :  { %v3738_v39 = vadd.f32 %v3107_v38, %v2705_v35  ;;  %v3109_v33 = vpop.f32.mrb[10].mxu0 }
 0x401   :  { %v3739_v40 = vadd.f32 %v3109_v33, %v2701_v34  ;;  %v3111_v41 = vpop.f32.mrb[11].mxu0  ;;  %v3114_v43 = vmax.f32 %v3737_v37, 0.0 }
 0x402   :  { %v3740_v42 = vadd.f32 %v3111_v41, %v2705_v35  ;;  %v3115_v44 = vmax.f32 %v3738_v39, 0.0 }
 0x403   :  { %v3116_v2 = vmax.f32 %v3739_v40, 0.0 }
 0x404   :  { %v3117_v60 = vmax.f32 %v3740_v42, 0.0 }
 0x405   :  { %v3118_v57 = vpack.c.bf16 %v3116_v2, %v3114_v43 }
 0x406   :  { %v3119_v8 = vpack.c.bf16 %v3117_v60, %v3115_v44 }
 0x408   :  { %3287 = vmatprep.mubr.bf16.mxu1 %v3119_v8 }
 0x409   :  { %3288 = vmatmul.mubr.bf16.vlgmr.msra.gmra.mrb[16].mxu1 %v3118_v57 }
 0x4dc   :  { %v3723_v3 = vpop.f32.mrb[16].mxu1 }
 0x4dd   :  { %v3724_v10 = vpop.f32.mrb[17].mxu1 }
 0x4de   :  { %v3725_v56 = vadd.f32 %v3724_v10, %v3723_v3  ;;  %v3726_v45 = vpop.f32.mrb[18].mxu1 }
 0x4df   :  { %v3727_v46 = vpop.f32.mrb[19].mxu1 }
 0x4e0   :  { %v3290_v47 = vadd.f32 %v3725_v56, %v3690_v9  ;;  %v3728_v48 = vadd.f32 %v3727_v46, %v3726_v45 }
 0x4e2   :  { %3296 = vst [vmem:[%s4585_s9] sm:$0xff] %v3290_v47  ;;  %v3293_v26 = vadd.f32 %v3728_v48, %v3690_v9 }
 0x4e4   :  { %3297 = vst [vmem:[%s4585_s9 + $0x8] sm:$0xff] %v3293_v26 }
 0x4e5   :  { %3302 = vsyncpa [#allocation3], 1 }
 0x4e6   :  { %3303 = vsyncpa [#allocation5], 1 }
 0x4e7   :  { %3304 = vsyncpa [#allocation8], 1 }

</bundles_post_ra>
